<compile_context>
chip_gen: v6e
topology: v6e:2x2x1
jax: 0.10.0
libtpu: 0.0.40
codegen_flags: <defaults>
</compile_context>

<pallas_src>
import math
from functools import partial

import jax
import jax.numpy as jnp
import numpy as np
from jax.experimental import pallas as pl
from jax.experimental.pallas import tpu as pltpu

LN_EPS = 1e-5


# ----------------------------- small math helpers -----------------------------

def _erf(x):
    # Abramowitz & Stegun 7.1.26 (max abs err ~1.5e-7); only ops that lower
    # cleanly in Mosaic.  Reciprocal goes to the EUP (approx).
    ax = jnp.abs(x)
    t = pl.reciprocal(1.0 + 0.3275911 * ax, approx=True)
    poly = ((((1.061405429 * t - 1.453152027) * t + 1.421413741) * t
             - 0.284496736) * t + 0.254829592) * t
    y = 1.0 - poly * jnp.exp(-ax * ax)
    return jnp.where(x >= 0, y, -y)


def _gelu_exact(x):
    # PyTorch F.gelu default ("exact" erf form).
    return 0.5 * x * (1.0 + _erf(x * (1.0 / math.sqrt(2.0))))


def _silu(x):
    return x * jax.nn.sigmoid(x)


def _layernorm(x, w, b):
    mu = jnp.mean(x, axis=-1, keepdims=True)
    xc = x - mu
    var = jnp.mean(xc * xc, axis=-1, keepdims=True)
    return xc * jax.lax.rsqrt(var + LN_EPS) * w + b


def sinusoidal_time_embedding(timesteps, hidden_dim):
    half = hidden_dim // 2
    emb = math.log(10000.0) / (half - 1)
    freqs = jnp.exp(jnp.arange(half, dtype=jnp.float32) * -emb)
    args = timesteps.astype(jnp.float32)[:, None] * freqs[None, :]
    return jnp.concatenate([jnp.sin(args), jnp.cos(args)], axis=-1)


def _round_up(x, m):
    return ((x + m - 1) // m) * m


# --------------------------------- the kernel ---------------------------------

def d3pm_unet_kernel(num_heads,
                     h0_ref, tfeat_ref,
                     wt1_ref, bt1_ref, wt2_ref, bt2_ref,
                     wqkv_ref, bqkv_ref, wo_ref, bo_ref,
                     w1_ref, b1_ref, w2_ref, b2_ref,
                     ln1w_ref, ln1b_ref, ln2w_ref, ln2b_ref,
                     wout_ref, bout_ref,
                     out_ref,
                     h_scratch):
    layer = pl.program_id(1)
    num_layers = pl.num_programs(1)

    BT, S, H = h0_ref.shape
    hd = H // num_heads
    scale = 1.0 / math.sqrt(hd)
    bf16 = jnp.bfloat16
    f32 = jnp.float32

    # ---- layer 0: time-step MLP + embedding sum -> initialize residual stream ----
    @pl.when(layer == 0)
    def _init():
        tf = tfeat_ref[...].reshape(BT, H)                       # (BT, H) f32
        t1 = jnp.dot(tf.astype(bf16), wt1_ref[...],
                     preferred_element_type=f32) + bt1_ref[...]
        t1 = _silu(t1)
        temb = jnp.dot(t1.astype(bf16), wt2_ref[...],
                       preferred_element_type=f32) + bt2_ref[...]
        h = h0_ref[...] + temb[:, None, :]                       # (BT, S, H)
        h_scratch[...] = h.reshape(BT * S, H)

    x = h_scratch[...]                                           # (BT*S, H) f32

    # ---- multi-head self attention (post-norm encoder layer) ----
    qkv = jnp.dot(x.astype(bf16), wqkv_ref[0],
                  preferred_element_type=f32) + bqkv_ref[0]      # (BT*S, 3H)

    ctx_heads = []
    for hh in range(num_heads):
        q = qkv[:, hh * hd:(hh + 1) * hd] * scale
        k = qkv[:, H + hh * hd:H + (hh + 1) * hd]
        v = qkv[:, 2 * H + hh * hd:2 * H + (hh + 1) * hd]
        ctx_rows = []
        for bt in range(BT):
            rs = slice(bt * S, (bt + 1) * S)
            qb = q[rs].astype(bf16)
            kb = k[rs].astype(bf16)
            vb = v[rs].astype(bf16)
            sc = jnp.einsum('qd,kd->qk', qb, kb,
                            preferred_element_type=f32)          # (S, S) f32
            sc = sc - jnp.max(sc, axis=-1, keepdims=True)
            e = jnp.exp(sc)
            p = e * pl.reciprocal(jnp.sum(e, axis=-1, keepdims=True), approx=True)
            ctx_rows.append(jnp.einsum('qk,kd->qd', p.astype(bf16), vb,
                                       preferred_element_type=f32))
        ctx_heads.append(jnp.concatenate(ctx_rows, axis=0) if BT > 1 else ctx_rows[0])

    ctx = jnp.concatenate(ctx_heads, axis=-1)                    # (BT*S, H)
    attn = jnp.dot(ctx.astype(bf16), wo_ref[0],
                   preferred_element_type=f32) + bo_ref[0]
    x = _layernorm(x + attn, ln1w_ref[0], ln1b_ref[0])

    # ---- feed-forward: Linear -> GELU(exact) -> Linear ----
    ff = jnp.dot(x.astype(bf16), w1_ref[0], preferred_element_type=f32) + b1_ref[0]
    ff = _gelu_exact(ff)
    ff = jnp.dot(ff.astype(bf16), w2_ref[0], preferred_element_type=f32) + b2_ref[0]
    x = _layernorm(x + ff, ln2w_ref[0], ln2b_ref[0])
    h_scratch[...] = x

    # ---- output projection to lane-padded vocab logits on the last layer ----
    @pl.when(layer == num_layers - 1)
    def _final():
        logits = jnp.dot(x.astype(bf16), wout_ref[...],
                         preferred_element_type=f32) + bout_ref[...]
        out_ref[...] = logits.reshape(BT, S, out_ref.shape[-1])


# --------------------------- one-time weight preparation -----------------------

def prepare_params(p, num_layers, num_heads):
    """Hoisted one-time preprocessing: transpose to (in,out), pad vocab lanes to
    128, cast matmul weights to bf16.  Cache the result across forward calls."""
    L = num_layers
    H = p['tok'].shape[1]
    V = p['out_w'].shape[0]
    Vp = _round_up(V, 128)
    f32, bf16 = jnp.float32, jnp.bfloat16

    w = {}
    w['tok'] = jnp.asarray(p['tok'], f32)
    w['pos'] = jnp.asarray(p['pos'], f32)
    w['wt1'] = jnp.asarray(p['wt1'].T, bf16)                       # (H, 4H)
    w['bt1'] = jnp.asarray(p['bt1'].reshape(1, -1), f32)
    w['wt2'] = jnp.asarray(p['wt2'].T, bf16)                       # (4H, H)
    w['bt2'] = jnp.asarray(p['bt2'].reshape(1, -1), f32)
    w['wqkv'] = jnp.asarray(p['in_proj_w'].transpose(0, 2, 1), bf16)   # (L, H, 3H)
    w['bqkv'] = jnp.asarray(p['in_proj_b'].reshape(L, 1, 3 * H), f32)
    w['wo'] = jnp.asarray(p['out_proj_w'].transpose(0, 2, 1), bf16)    # (L, H, H)
    w['bo'] = jnp.asarray(p['out_proj_b'].reshape(L, 1, H), f32)
    w['w1'] = jnp.asarray(p['lin1_w'].transpose(0, 2, 1), bf16)        # (L, H, 4H)
    w['b1'] = jnp.asarray(p['lin1_b'].reshape(L, 1, 4 * H), f32)
    w['w2'] = jnp.asarray(p['lin2_w'].transpose(0, 2, 1), bf16)        # (L, 4H, H)
    w['b2'] = jnp.asarray(p['lin2_b'].reshape(L, 1, H), f32)
    w['ln1w'] = jnp.asarray(p['ln1_w'].reshape(L, 1, H), f32)
    w['ln1b'] = jnp.asarray(p['ln1_b'].reshape(L, 1, H), f32)
    w['ln2w'] = jnp.asarray(p['ln2_w'].reshape(L, 1, H), f32)
    w['ln2b'] = jnp.asarray(p['ln2_b'].reshape(L, 1, H), f32)
    wout = jnp.zeros((H, Vp), f32).at[:, :V].set(jnp.asarray(p['out_w'], f32).T)
    w['wout'] = wout.astype(bf16)
    w['bout'] = jnp.zeros((1, Vp), f32).at[:, :V].set(
        jnp.asarray(p['out_b'], f32).reshape(1, -1))
    w['vocab'] = V
    return w


# ------------------------------ python wrapper ---------------------------------

def d3pm_unet_forward(w, x, timesteps, num_layers, num_heads, batch_tile=1):
    B, S = x.shape
    H = w['tok'].shape[1]
    Vp = w['wout'].shape[1]
    V = w['vocab']
    L = num_layers
    assert B % batch_tile == 0
    BT = batch_tile
    NT = B // BT
    # TODO(synk): at large B, use batch_tile > 1 (multiple sequences per row
    # tile) so the matmul M dimension fills 128/256 MXU sublanes.

    # Glue: embedding gathers + sinusoidal time features (plain JAX).
    tok = jnp.take(w['tok'], x, axis=0)                       # (B, S, H)
    pos = w['pos'][:S][None, :, :]
    h0 = (tok + pos).astype(jnp.float32)
    tfeat = sinusoidal_time_embedding(timesteps, H).reshape(B, 1, H)
    # TODO(synk): optional esm_features branch (lazily-created esm_projection
    # Linear) is not exercised here (esm_features=None).

    def tile_map(i, l):      # activation / output tiles follow the row-tile axis
        return (i, 0, 0)

    def layer_map(i, l):     # per-layer weights / biases stream with the layer axis
        return (l, 0, 0)

    def const_map(i, l):     # layer-independent weights: fetched once, kept resident
        return (0, 0)

    in_specs = [
        pl.BlockSpec((BT, S, H), tile_map),           # h0
        pl.BlockSpec((BT, 1, H), tile_map),           # tfeat
        pl.BlockSpec((H, 4 * H), const_map),          # wt1
        pl.BlockSpec((1, 4 * H), const_map),          # bt1
        pl.BlockSpec((4 * H, H), const_map),          # wt2
        pl.BlockSpec((1, H), const_map),              # bt2
        pl.BlockSpec((1, H, 3 * H), layer_map),       # wqkv
        pl.BlockSpec((1, 1, 3 * H), layer_map),       # bqkv
        pl.BlockSpec((1, H, H), layer_map),           # wo
        pl.BlockSpec((1, 1, H), layer_map),           # bo
        pl.BlockSpec((1, H, 4 * H), layer_map),       # w1
        pl.BlockSpec((1, 1, 4 * H), layer_map),       # b1
        pl.BlockSpec((1, 4 * H, H), layer_map),       # w2
        pl.BlockSpec((1, 1, H), layer_map),           # b2
        pl.BlockSpec((1, 1, H), layer_map),           # ln1w
        pl.BlockSpec((1, 1, H), layer_map),           # ln1b
        pl.BlockSpec((1, 1, H), layer_map),           # ln2w
        pl.BlockSpec((1, 1, H), layer_map),           # ln2b
        pl.BlockSpec((H, Vp), const_map),             # wout
        pl.BlockSpec((1, Vp), const_map),             # bout
    ]
    out_spec = pl.BlockSpec((BT, S, Vp), tile_map)

    # VMEM budget: double-buffered per-layer bf16 weights + resident consts +
    # activations, with headroom; clamped below v7x's 64 MiB physical VMEM.
    per_layer = 2 * (H * 3 * H + H * H + 2 * H * 4 * H)           # bf16 bytes
    const = 2 * (2 * 4 * H * H + H * Vp)
    act = 4 * (BT * S * (H + 4 * H + 3 * H + Vp))
    vmem_bytes = int(min(56 * 1024 * 1024,
                         max(32 * 1024 * 1024,
                             4 * per_layer + 2 * const + 6 * act)))

    kernel = partial(d3pm_unet_kernel, num_heads)
    out = pl.pallas_call(
        kernel,
        out_shape=jax.ShapeDtypeStruct((B, S, Vp), jnp.float32),
        grid=(NT, L),
        in_specs=in_specs,
        out_specs=out_spec,
        scratch_shapes=[pltpu.VMEM((BT * S, H), jnp.float32)],
        compiler_params=pltpu.CompilerParams(
            dimension_semantics=("parallel", "arbitrary"),
            vmem_limit_bytes=vmem_bytes),
    )(h0, tfeat,
      w['wt1'], w['bt1'], w['wt2'], w['bt2'],
      w['wqkv'], w['bqkv'], w['wo'], w['bo'],
      w['w1'], w['b1'], w['w2'], w['b2'],
      w['ln1w'], w['ln1b'], w['ln2w'], w['ln2b'],
      w['wout'], w['bout'])
    return out[:, :, :V]


# ------------------------- pure-JAX reference (PyTorch semantics) ---------------

def reference_forward(p, x, timesteps, num_layers, num_heads):
    B, S = x.shape
    H = p['tok'].shape[1]
    hd = H // num_heads
    tok = jnp.take(p['tok'], x, axis=0)
    pos = p['pos'][:S][None, :, :]
    tfeat = sinusoidal_time_embedding(timesteps, H)
    t1 = tfeat @ p['wt1'].T + p['bt1']
    t1 = t1 * jax.nn.sigmoid(t1)
    temb = t1 @ p['wt2'].T + p['bt2']
    h = tok + pos + temb[:, None, :]
    for l in range(num_layers):
        qkv = h @ p['in_proj_w'][l].T + p['in_proj_b'][l]
        q, k, v = jnp.split(qkv, 3, axis=-1)
        q = q.reshape(B, S, num_heads, hd).transpose(0, 2, 1, 3)
        k = k.reshape(B, S, num_heads, hd).transpose(0, 2, 1, 3)
        v = v.reshape(B, S, num_heads, hd).transpose(0, 2, 1, 3)
        sc = jnp.einsum('bhqd,bhkd->bhqk', q, k) / math.sqrt(hd)
        a = jax.nn.softmax(sc, axis=-1)
        ctx = jnp.einsum('bhqk,bhkd->bhqd', a, v).transpose(0, 2, 1, 3).reshape(B, S, H)
        attn = ctx @ p['out_proj_w'][l].T + p['out_proj_b'][l]
        h = _layernorm(h + attn, p['ln1_w'][l], p['ln1_b'][l])
        ff = h @ p['lin1_w'][l].T + p['lin1_b'][l]
        ff = jax.nn.gelu(ff, approximate=False)
        ff = ff @ p['lin2_w'][l].T + p['lin2_b'][l]
        h = _layernorm(h + ff, p['ln2_w'][l], p['ln2_b'][l])
    return h @ p['out_w'].T + p['out_b']


# ----------------------------- deterministic params ----------------------------

def init_params(key, vocab, hidden, layers, max_len):
    ks = jax.random.split(key, 20)

    def n(k, shape, scale=0.05):
        return scale * jax.random.normal(k, shape, dtype=jnp.float32)

    p = {}
    p['tok'] = n(ks[0], (vocab, hidden))
    p['pos'] = n(ks[1], (max_len, hidden))
    p['wt1'] = n(ks[2], (4 * hidden, hidden)); p['bt1'] = n(ks[3], (4 * hidden,))
    p['wt2'] = n(ks[4], (hidden, 4 * hidden)); p['bt2'] = n(ks[5], (hidden,))
    p['in_proj_w'] = n(ks[6], (layers, 3 * hidden, hidden))
    p['in_proj_b'] = n(ks[7], (layers, 3 * hidden))
    p['out_proj_w'] = n(ks[8], (layers, hidden, hidden))
    p['out_proj_b'] = n(ks[9], (layers, hidden))
    p['lin1_w'] = n(ks[10], (layers, 4 * hidden, hidden))
    p['lin1_b'] = n(ks[11], (layers, 4 * hidden))
    p['lin2_w'] = n(ks[12], (layers, hidden, 4 * hidden))
    p['lin2_b'] = n(ks[13], (layers, hidden))
    p['ln1_w'] = 1.0 + n(ks[14], (layers, hidden), 0.1)
    p['ln1_b'] = n(ks[15], (layers, hidden), 0.1)
    p['ln2_w'] = 1.0 + n(ks[16], (layers, hidden), 0.1)
    p['ln2_b'] = n(ks[17], (layers, hidden), 0.1)
    p['out_w'] = n(ks[18], (vocab, hidden))
    p['out_b'] = n(ks[19], (vocab,))
    return p


if __name__ == "__main__":
    # Small config consistent with the module (vocab=21 kept, hidden/layers shrunk).
    B, S = 2, 8
    VOCAB, HIDDEN, LAYERS, HEADS, MAXLEN = 21, 32, 2, 4, 16

    key = jax.random.PRNGKey(0)
    kp, kx = jax.random.split(key)
    params = init_params(kp, VOCAB, HIDDEN, LAYERS, MAXLEN)

    x = jax.random.randint(kx, (B, S), 0, VOCAB, dtype=jnp.int32)
    timesteps = jnp.array([3, 17], dtype=jnp.int32)

    prepped = prepare_params(params, LAYERS, HEADS)   # hoisted, one-time weight prep
    logits = d3pm_unet_forward(prepped, x, timesteps, LAYERS, HEADS, batch_tile=1)
    logits = jax.block_until_ready(logits)
    assert logits.shape == (B, S, VOCAB)

    ref = reference_forward(params, x, timesteps, LAYERS, HEADS)
    np.testing.assert_allclose(np.asarray(logits), np.asarray(ref), rtol=2e-2, atol=2e-2)

    print("KERNEL_OK")
</pallas_src>

<mosaic_0001>
module attributes {stable_mosaic.version = 11 : i64} {
  func.func @d3pm_unet_kernel(%arg0: i32, %arg1: i32, %arg2: memref<1x8x32xf32, #tpu.memory_space<vmem>>, %arg3: memref<1x1x32xf32, #tpu.memory_space<vmem>>, %arg4: memref<32x128xbf16, #tpu.memory_space<vmem>>, %arg5: memref<1x128xf32, #tpu.memory_space<vmem>>, %arg6: memref<128x32xbf16, #tpu.memory_space<vmem>>, %arg7: memref<1x32xf32, #tpu.memory_space<vmem>>, %arg8: memref<1x32x96xbf16, #tpu.memory_space<vmem>>, %arg9: memref<1x1x96xf32, #tpu.memory_space<vmem>>, %arg10: memref<1x32x32xbf16, #tpu.memory_space<vmem>>, %arg11: memref<1x1x32xf32, #tpu.memory_space<vmem>>, %arg12: memref<1x32x128xbf16, #tpu.memory_space<vmem>>, %arg13: memref<1x1x128xf32, #tpu.memory_space<vmem>>, %arg14: memref<1x128x32xbf16, #tpu.memory_space<vmem>>, %arg15: memref<1x1x32xf32, #tpu.memory_space<vmem>>, %arg16: memref<1x1x32xf32, #tpu.memory_space<vmem>>, %arg17: memref<1x1x32xf32, #tpu.memory_space<vmem>>, %arg18: memref<1x1x32xf32, #tpu.memory_space<vmem>>, %arg19: memref<1x1x32xf32, #tpu.memory_space<vmem>>, %arg20: memref<32x128xbf16, #tpu.memory_space<vmem>>, %arg21: memref<1x128xf32, #tpu.memory_space<vmem>>, %arg22: memref<1x8x128xf32, #tpu.memory_space<vmem>>, %arg23: memref<8x32xf32, #tpu.memory_space<vmem>>) attributes {dimension_semantics = [#tpu.dimension_semantics<parallel>, #tpu.dimension_semantics<arbitrary>], iteration_bounds = array<i64: 2, 2>, scalar_prefetch = 0 : i64, scratch_operands = 1 : i64, tpu.core_type = #tpu.core_type<tc>, window_params = [{transform_indices = @transform_0, window_bounds = array<i64: 1, 8, 32>}, {transform_indices = @transform_1, window_bounds = array<i64: 1, 1, 32>}, {pipeline_mode = #tpu.pipeline_mode<synchronous>, transform_indices = @transform_2, window_bounds = array<i64: 32, 128>}, {pipeline_mode = #tpu.pipeline_mode<synchronous>, transform_indices = @transform_3, window_bounds = array<i64: 1, 128>}, {pipeline_mode = #tpu.pipeline_mode<synchronous>, transform_indices = @transform_4, window_bounds = array<i64: 128, 32>}, {pipeline_mode = #tpu.pipeline_mode<synchronous>, transform_indices = @transform_5, window_bounds = array<i64: 1, 32>}, {transform_indices = @transform_6, window_bounds = array<i64: 1, 32, 96>}, {transform_indices = @transform_7, window_bounds = array<i64: 1, 1, 96>}, {transform_indices = @transform_8, window_bounds = array<i64: 1, 32, 32>}, {transform_indices = @transform_9, window_bounds = array<i64: 1, 1, 32>}, {transform_indices = @transform_10, window_bounds = array<i64: 1, 32, 128>}, {transform_indices = @transform_11, window_bounds = array<i64: 1, 1, 128>}, {transform_indices = @transform_12, window_bounds = array<i64: 1, 128, 32>}, {transform_indices = @transform_13, window_bounds = array<i64: 1, 1, 32>}, {transform_indices = @transform_14, window_bounds = array<i64: 1, 1, 32>}, {transform_indices = @transform_15, window_bounds = array<i64: 1, 1, 32>}, {transform_indices = @transform_16, window_bounds = array<i64: 1, 1, 32>}, {transform_indices = @transform_17, window_bounds = array<i64: 1, 1, 32>}, {pipeline_mode = #tpu.pipeline_mode<synchronous>, transform_indices = @transform_18, window_bounds = array<i64: 32, 128>}, {pipeline_mode = #tpu.pipeline_mode<synchronous>, transform_indices = @transform_19, window_bounds = array<i64: 1, 128>}, {transform_indices = @transform_20, window_bounds = array<i64: 1, 8, 128>}]} {
    %c0_i32 = arith.constant 0 : i32
    %0 = arith.cmpi eq, %arg1, %c0_i32 : i32
    %1 = arith.extui %0 : i1 to i32
    %c0_i32_0 = arith.constant 0 : i32
    %2 = arith.cmpi ne, %1, %c0_i32_0 : i32
    scf.if %2 {
      %c0_88 = arith.constant 0 : index
      %c0_89 = arith.constant 0 : index
      %c0_90 = arith.constant 0 : index
      %214 = vector.load %arg3[%c0_88, %c0_89, %c0_90] : memref<1x1x32xf32, #tpu.memory_space<vmem>>, vector<1x1x32xf32>
      %215 = vector.shape_cast %214 : vector<1x1x32xf32> to vector<1x32xf32>
      %216 = arith.truncf %215 : vector<1x32xf32> to vector<1x32xbf16>
      %c0_91 = arith.constant 0 : index
      %c0_92 = arith.constant 0 : index
      %217 = vector.load %arg4[%c0_91, %c0_92] : memref<32x128xbf16, #tpu.memory_space<vmem>>, vector<32x128xbf16>
      %cst_93 = arith.constant dense<0.000000e+00> : vector<1x128xf32>
      %218 = tpu.matmul %216, %217, %cst_93 {dimension_numbers = #tpu.dot_dimension_numbers<[1], [0], [0], [1], [0, 0, 1, 1], [], []>} : vector<1x32xbf16>, vector<32x128xbf16>, vector<1x128xf32> -> vector<1x128xf32>
      %c0_94 = arith.constant 0 : index
      %c0_95 = arith.constant 0 : index
      %219 = vector.load %arg5[%c0_94, %c0_95] : memref<1x128xf32, #tpu.memory_space<vmem>>, vector<1x128xf32>
      %220 = arith.addf %218, %219 : vector<1x128xf32>
      %221 = arith.negf %220 : vector<1x128xf32>
      %222 = math.exp %221 : vector<1x128xf32>
      %cst_96 = arith.constant 1.000000e+00 : f32
      %223 = vector.broadcast %cst_96 : f32 to vector<1x128xf32>
      %224 = arith.addf %223, %222 : vector<1x128xf32>
      %225 = arith.divf %223, %224 : vector<1x128xf32>
      %226 = arith.mulf %220, %225 : vector<1x128xf32>
      %227 = arith.truncf %226 : vector<1x128xf32> to vector<1x128xbf16>
      %c0_97 = arith.constant 0 : index
      %c0_98 = arith.constant 0 : index
      %228 = vector.load %arg6[%c0_97, %c0_98] : memref<128x32xbf16, #tpu.memory_space<vmem>>, vector<128x32xbf16>
      %cst_99 = arith.constant dense<0.000000e+00> : vector<1x32xf32>
      %229 = tpu.matmul %227, %228, %cst_99 {dimension_numbers = #tpu.dot_dimension_numbers<[1], [0], [0], [1], [0, 0, 1, 1], [], []>} : vector<1x128xbf16>, vector<128x32xbf16>, vector<1x32xf32> -> vector<1x32xf32>
      %c0_100 = arith.constant 0 : index
      %c0_101 = arith.constant 0 : index
      %230 = vector.load %arg7[%c0_100, %c0_101] : memref<1x32xf32, #tpu.memory_space<vmem>>, vector<1x32xf32>
      %231 = arith.addf %229, %230 : vector<1x32xf32>
      %c0_102 = arith.constant 0 : index
      %c0_103 = arith.constant 0 : index
      %c0_104 = arith.constant 0 : index
      %232 = vector.load %arg2[%c0_102, %c0_103, %c0_104] : memref<1x8x32xf32, #tpu.memory_space<vmem>>, vector<1x8x32xf32>
      %233 = vector.shape_cast %231 : vector<1x32xf32> to vector<1x1x32xf32>
      %234 = vector.broadcast %233 : vector<1x1x32xf32> to vector<1x8x32xf32>
      %235 = arith.addf %232, %234 : vector<1x8x32xf32>
      %236 = vector.shape_cast %235 : vector<1x8x32xf32> to vector<8x32xf32>
      %c0_105 = arith.constant 0 : index
      %c0_106 = arith.constant 0 : index
      %237 = vector.load %arg23[%c0_105, %c0_106] : memref<8x32xf32, #tpu.memory_space<vmem>>, vector<8x32xf32>
      tpu.vector_store %arg23[%c0_105, %c0_106], %236 {strides = array<i32>} : memref<8x32xf32, #tpu.memory_space<vmem>>, vector<8x32xf32>,
    } else {
    }
    %c0 = arith.constant 0 : index
    %c0_1 = arith.constant 0 : index
    %3 = vector.load %arg23[%c0, %c0_1] : memref<8x32xf32, #tpu.memory_space<vmem>>, vector<8x32xf32>
    %4 = arith.truncf %3 : vector<8x32xf32> to vector<8x32xbf16>
    %c0_2 = arith.constant 0 : index
    %c0_3 = arith.constant 0 : index
    %c0_4 = arith.constant 0 : index
    %5 = vector.load %arg8[%c0_2, %c0_3, %c0_4] : memref<1x32x96xbf16, #tpu.memory_space<vmem>>, vector<1x32x96xbf16>
    %6 = vector.shape_cast %5 : vector<1x32x96xbf16> to vector<32x96xbf16>
    %cst = arith.constant dense<0.000000e+00> : vector<8x96xf32>
    %7 = tpu.matmul %4, %6, %cst {dimension_numbers = #tpu.dot_dimension_numbers<[1], [0], [0], [1], [0, 0, 1, 1], [], []>} : vector<8x32xbf16>, vector<32x96xbf16>, vector<8x96xf32> -> vector<8x96xf32>
    %c0_5 = arith.constant 0 : index
    %c0_6 = arith.constant 0 : index
    %c0_7 = arith.constant 0 : index
    %8 = vector.load %arg9[%c0_5, %c0_6, %c0_7] : memref<1x1x96xf32, #tpu.memory_space<vmem>>, vector<1x1x96xf32>
    %9 = vector.shape_cast %8 : vector<1x1x96xf32> to vector<1x96xf32>
    %10 = vector.broadcast %9 : vector<1x96xf32> to vector<8x96xf32>
    %11 = arith.addf %7, %10 : vector<8x96xf32>
    %12 = vector.extract_strided_slice %11 {offsets = [0, 0], sizes = [8, 8], strides = [1, 1]} : vector<8x96xf32> to vector<8x8xf32>
    %cst_8 = arith.constant 0.353553385 : f32
    %13 = vector.broadcast %cst_8 : f32 to vector<8x8xf32>
    %14 = arith.mulf %12, %13 : vector<8x8xf32>
    %15 = vector.extract_strided_slice %11 {offsets = [0, 32], sizes = [8, 8], strides = [1, 1]} : vector<8x96xf32> to vector<8x8xf32>
    %16 = vector.extract_strided_slice %11 {offsets = [0, 64], sizes = [8, 8], strides = [1, 1]} : vector<8x96xf32> to vector<8x8xf32>
    %17 = arith.truncf %14 : vector<8x8xf32> to vector<8x8xbf16>
    %18 = arith.truncf %15 : vector<8x8xf32> to vector<8x8xbf16>
    %19 = arith.truncf %16 : vector<8x8xf32> to vector<8x8xbf16>
    "tpu.trace_start"() <{level = 10 : i32, message = "qd,kd->qk"}> : () -> ()
    %cst_9 = arith.constant dense<0.000000e+00> : vector<8x8xf32>
    %20 = tpu.matmul %17, %18, %cst_9 {dimension_numbers = #tpu.dot_dimension_numbers<[1], [1], [0], [0], [0, 0, 1, 0], [], []>} : vector<8x8xbf16>, vector<8x8xbf16>, vector<8x8xf32> -> vector<8x8xf32>
    "tpu.trace_stop"() : () -> ()
    %cst_10 = arith.constant dense<0xFF800000> : vector<8xf32>
    %21 = vector.multi_reduction <maximumf>, %20, %cst_10 [1] : vector<8x8xf32> to vector<8xf32>
    %22 = vector.shape_cast %21 : vector<8xf32> to vector<8x1xf32>
    %23 = vector.broadcast %22 : vector<8x1xf32> to vector<8x8xf32>
    %24 = arith.subf %20, %23 : vector<8x8xf32>
    %25 = math.exp %24 : vector<8x8xf32>
    %cst_11 = arith.constant dense<0.000000e+00> : vector<8xf32>
    %26 = vector.multi_reduction <add>, %25, %cst_11 [1] : vector<8x8xf32> to vector<8xf32>
    %27 = vector.shape_cast %26 : vector<8xf32> to vector<8x1xf32>
    %28 = tpu.reciprocal %27 {approx = true} : vector<8x1xf32> -> vector<8x1xf32>
    %29 = vector.broadcast %28 : vector<8x1xf32> to vector<8x8xf32>
    %30 = arith.mulf %25, %29 : vector<8x8xf32>
    %31 = arith.truncf %30 : vector<8x8xf32> to vector<8x8xbf16>
    "tpu.trace_start"() <{level = 10 : i32, message = "qk,kd->qd"}> : () -> ()
    %cst_12 = arith.constant dense<0.000000e+00> : vector<8x8xf32>
    %32 = tpu.matmul %31, %19, %cst_12 {dimension_numbers = #tpu.dot_dimension_numbers<[1], [0], [0], [1], [0, 0, 1, 1], [], []>} : vector<8x8xbf16>, vector<8x8xbf16>, vector<8x8xf32> -> vector<8x8xf32>
    "tpu.trace_stop"() : () -> ()
    %33 = vector.extract_strided_slice %11 {offsets = [0, 8], sizes = [8, 8], strides = [1, 1]} : vector<8x96xf32> to vector<8x8xf32>
    %cst_13 = arith.constant 0.353553385 : f32
    %34 = vector.broadcast %cst_13 : f32 to vector<8x8xf32>
    %35 = arith.mulf %33, %34 : vector<8x8xf32>
    %36 = vector.extract_strided_slice %11 {offsets = [0, 40], sizes = [8, 8], strides = [1, 1]} : vector<8x96xf32> to vector<8x8xf32>
    %37 = vector.extract_strided_slice %11 {offsets = [0, 72], sizes = [8, 8], strides = [1, 1]} : vector<8x96xf32> to vector<8x8xf32>
    %38 = arith.truncf %35 : vector<8x8xf32> to vector<8x8xbf16>
    %39 = arith.truncf %36 : vector<8x8xf32> to vector<8x8xbf16>
    %40 = arith.truncf %37 : vector<8x8xf32> to vector<8x8xbf16>
    "tpu.trace_start"() <{level = 10 : i32, message = "qd,kd->qk"}> : () -> ()
    %cst_14 = arith.constant dense<0.000000e+00> : vector<8x8xf32>
    %41 = tpu.matmul %38, %39, %cst_14 {dimension_numbers = #tpu.dot_dimension_numbers<[1], [1], [0], [0], [0, 0, 1, 0], [], []>} : vector<8x8xbf16>, vector<8x8xbf16>, vector<8x8xf32> -> vector<8x8xf32>
    "tpu.trace_stop"() : () -> ()
    %cst_15 = arith.constant dense<0xFF800000> : vector<8xf32>
    %42 = vector.multi_reduction <maximumf>, %41, %cst_15 [1] : vector<8x8xf32> to vector<8xf32>
    %43 = vector.shape_cast %42 : vector<8xf32> to vector<8x1xf32>
    %44 = vector.broadcast %43 : vector<8x1xf32> to vector<8x8xf32>
    %45 = arith.subf %41, %44 : vector<8x8xf32>
    %46 = math.exp %45 : vector<8x8xf32>
    %cst_16 = arith.constant dense<0.000000e+00> : vector<8xf32>
    %47 = vector.multi_reduction <add>, %46, %cst_16 [1] : vector<8x8xf32> to vector<8xf32>
    %48 = vector.shape_cast %47 : vector<8xf32> to vector<8x1xf32>
    %49 = tpu.reciprocal %48 {approx = true} : vector<8x1xf32> -> vector<8x1xf32>
    %50 = vector.broadcast %49 : vector<8x1xf32> to vector<8x8xf32>
    %51 = arith.mulf %46, %50 : vector<8x8xf32>
    %52 = arith.truncf %51 : vector<8x8xf32> to vector<8x8xbf16>
    "tpu.trace_start"() <{level = 10 : i32, message = "qk,kd->qd"}> : () -> ()
    %cst_17 = arith.constant dense<0.000000e+00> : vector<8x8xf32>
    %53 = tpu.matmul %52, %40, %cst_17 {dimension_numbers = #tpu.dot_dimension_numbers<[1], [0], [0], [1], [0, 0, 1, 1], [], []>} : vector<8x8xbf16>, vector<8x8xbf16>, vector<8x8xf32> -> vector<8x8xf32>
    "tpu.trace_stop"() : () -> ()
    %54 = vector.extract_strided_slice %11 {offsets = [0, 16], sizes = [8, 8], strides = [1, 1]} : vector<8x96xf32> to vector<8x8xf32>
    %cst_18 = arith.constant 0.353553385 : f32
    %55 = vector.broadcast %cst_18 : f32 to vector<8x8xf32>
    %56 = arith.mulf %54, %55 : vector<8x8xf32>
    %57 = vector.extract_strided_slice %11 {offsets = [0, 48], sizes = [8, 8], strides = [1, 1]} : vector<8x96xf32> to vector<8x8xf32>
    %58 = vector.extract_strided_slice %11 {offsets = [0, 80], sizes = [8, 8], strides = [1, 1]} : vector<8x96xf32> to vector<8x8xf32>
    %59 = arith.truncf %56 : vector<8x8xf32> to vector<8x8xbf16>
    %60 = arith.truncf %57 : vector<8x8xf32> to vector<8x8xbf16>
    %61 = arith.truncf %58 : vector<8x8xf32> to vector<8x8xbf16>
    "tpu.trace_start"() <{level = 10 : i32, message = "qd,kd->qk"}> : () -> ()
    %cst_19 = arith.constant dense<0.000000e+00> : vector<8x8xf32>
    %62 = tpu.matmul %59, %60, %cst_19 {dimension_numbers = #tpu.dot_dimension_numbers<[1], [1], [0], [0], [0, 0, 1, 0], [], []>} : vector<8x8xbf16>, vector<8x8xbf16>, vector<8x8xf32> -> vector<8x8xf32>
    "tpu.trace_stop"() : () -> ()
    %cst_20 = arith.constant dense<0xFF800000> : vector<8xf32>
    %63 = vector.multi_reduction <maximumf>, %62, %cst_20 [1] : vector<8x8xf32> to vector<8xf32>
    %64 = vector.shape_cast %63 : vector<8xf32> to vector<8x1xf32>
    %65 = vector.broadcast %64 : vector<8x1xf32> to vector<8x8xf32>
    %66 = arith.subf %62, %65 : vector<8x8xf32>
    %67 = math.exp %66 : vector<8x8xf32>
    %cst_21 = arith.constant dense<0.000000e+00> : vector<8xf32>
    %68 = vector.multi_reduction <add>, %67, %cst_21 [1] : vector<8x8xf32> to vector<8xf32>
    %69 = vector.shape_cast %68 : vector<8xf32> to vector<8x1xf32>
    %70 = tpu.reciprocal %69 {approx = true} : vector<8x1xf32> -> vector<8x1xf32>
    %71 = vector.broadcast %70 : vector<8x1xf32> to vector<8x8xf32>
    %72 = arith.mulf %67, %71 : vector<8x8xf32>
    %73 = arith.truncf %72 : vector<8x8xf32> to vector<8x8xbf16>
    "tpu.trace_start"() <{level = 10 : i32, message = "qk,kd->qd"}> : () -> ()
    %cst_22 = arith.constant dense<0.000000e+00> : vector<8x8xf32>
    %74 = tpu.matmul %73, %61, %cst_22 {dimension_numbers = #tpu.dot_dimension_numbers<[1], [0], [0], [1], [0, 0, 1, 1], [], []>} : vector<8x8xbf16>, vector<8x8xbf16>, vector<8x8xf32> -> vector<8x8xf32>
    "tpu.trace_stop"() : () -> ()
    %75 = vector.extract_strided_slice %11 {offsets = [0, 24], sizes = [8, 8], strides = [1, 1]} : vector<8x96xf32> to vector<8x8xf32>
    %cst_23 = arith.constant 0.353553385 : f32
    %76 = vector.broadcast %cst_23 : f32 to vector<8x8xf32>
    %77 = arith.mulf %75, %76 : vector<8x8xf32>
    %78 = vector.extract_strided_slice %11 {offsets = [0, 56], sizes = [8, 8], strides = [1, 1]} : vector<8x96xf32> to vector<8x8xf32>
    %79 = vector.extract_strided_slice %11 {offsets = [0, 88], sizes = [8, 8], strides = [1, 1]} : vector<8x96xf32> to vector<8x8xf32>
    %80 = arith.truncf %77 : vector<8x8xf32> to vector<8x8xbf16>
    %81 = arith.truncf %78 : vector<8x8xf32> to vector<8x8xbf16>
    %82 = arith.truncf %79 : vector<8x8xf32> to vector<8x8xbf16>
    "tpu.trace_start"() <{level = 10 : i32, message = "qd,kd->qk"}> : () -> ()
    %cst_24 = arith.constant dense<0.000000e+00> : vector<8x8xf32>
    %83 = tpu.matmul %80, %81, %cst_24 {dimension_numbers = #tpu.dot_dimension_numbers<[1], [1], [0], [0], [0, 0, 1, 0], [], []>} : vector<8x8xbf16>, vector<8x8xbf16>, vector<8x8xf32> -> vector<8x8xf32>
    "tpu.trace_stop"() : () -> ()
    %cst_25 = arith.constant dense<0xFF800000> : vector<8xf32>
    %84 = vector.multi_reduction <maximumf>, %83, %cst_25 [1] : vector<8x8xf32> to vector<8xf32>
    %85 = vector.shape_cast %84 : vector<8xf32> to vector<8x1xf32>
    %86 = vector.broadcast %85 : vector<8x1xf32> to vector<8x8xf32>
    %87 = arith.subf %83, %86 : vector<8x8xf32>
    %88 = math.exp %87 : vector<8x8xf32>
    %cst_26 = arith.constant dense<0.000000e+00> : vector<8xf32>
    %89 = vector.multi_reduction <add>, %88, %cst_26 [1] : vector<8x8xf32> to vector<8xf32>
    %90 = vector.shape_cast %89 : vector<8xf32> to vector<8x1xf32>
    %91 = tpu.reciprocal %90 {approx = true} : vector<8x1xf32> -> vector<8x1xf32>
    %92 = vector.broadcast %91 : vector<8x1xf32> to vector<8x8xf32>
    %93 = arith.mulf %88, %92 : vector<8x8xf32>
    %94 = arith.truncf %93 : vector<8x8xf32> to vector<8x8xbf16>
    "tpu.trace_start"() <{level = 10 : i32, message = "qk,kd->qd"}> : () -> ()
    %cst_27 = arith.constant dense<0.000000e+00> : vector<8x8xf32>
    %95 = tpu.matmul %94, %82, %cst_27 {dimension_numbers = #tpu.dot_dimension_numbers<[1], [0], [0], [1], [0, 0, 1, 1], [], []>} : vector<8x8xbf16>, vector<8x8xbf16>, vector<8x8xf32> -> vector<8x8xf32>
    "tpu.trace_stop"() : () -> ()
    %96 = tpu.concatenate %32, %53, %74, %95 in 1 : vector<8x8xf32>, vector<8x8xf32>, vector<8x8xf32>, vector<8x8xf32> -> vector<8x32xf32>
    %97 = arith.truncf %96 : vector<8x32xf32> to vector<8x32xbf16>
    %c0_28 = arith.constant 0 : index
    %c0_29 = arith.constant 0 : index
    %c0_30 = arith.constant 0 : index
    %98 = vector.load %arg10[%c0_28, %c0_29, %c0_30] : memref<1x32x32xbf16, #tpu.memory_space<vmem>>, vector<1x32x32xbf16>
    %99 = vector.shape_cast %98 : vector<1x32x32xbf16> to vector<32x32xbf16>
    %cst_31 = arith.constant dense<0.000000e+00> : vector<8x32xf32>
    %100 = tpu.matmul %97, %99, %cst_31 {dimension_numbers = #tpu.dot_dimension_numbers<[1], [0], [0], [1], [0, 0, 1, 1], [], []>} : vector<8x32xbf16>, vector<32x32xbf16>, vector<8x32xf32> -> vector<8x32xf32>
    %c0_32 = arith.constant 0 : index
    %c0_33 = arith.constant 0 : index
    %c0_34 = arith.constant 0 : index
    %101 = vector.load %arg11[%c0_32, %c0_33, %c0_34] : memref<1x1x32xf32, #tpu.memory_space<vmem>>, vector<1x1x32xf32>
    %102 = vector.shape_cast %101 : vector<1x1x32xf32> to vector<1x32xf32>
    %103 = vector.broadcast %102 : vector<1x32xf32> to vector<8x32xf32>
    %104 = arith.addf %100, %103 : vector<8x32xf32>
    %105 = arith.addf %3, %104 : vector<8x32xf32>
    %c0_35 = arith.constant 0 : index
    %c0_36 = arith.constant 0 : index
    %c0_37 = arith.constant 0 : index
    %106 = vector.load %arg16[%c0_35, %c0_36, %c0_37] : memref<1x1x32xf32, #tpu.memory_space<vmem>>, vector<1x1x32xf32>
    %107 = vector.shape_cast %106 : vector<1x1x32xf32> to vector<1x32xf32>
    %c0_38 = arith.constant 0 : index
    %c0_39 = arith.constant 0 : index
    %c0_40 = arith.constant 0 : index
    %108 = vector.load %arg17[%c0_38, %c0_39, %c0_40] : memref<1x1x32xf32, #tpu.memory_space<vmem>>, vector<1x1x32xf32>
    %109 = vector.shape_cast %108 : vector<1x1x32xf32> to vector<1x32xf32>
    %cst_41 = arith.constant dense<0.000000e+00> : vector<8xf32>
    %110 = vector.multi_reduction <add>, %105, %cst_41 [1] : vector<8x32xf32> to vector<8xf32>
    %111 = vector.shape_cast %110 : vector<8xf32> to vector<8x1xf32>
    %cst_42 = arith.constant 3.200000e+01 : f32
    %112 = vector.broadcast %cst_42 : f32 to vector<8x1xf32>
    %113 = arith.divf %111, %112 : vector<8x1xf32>
    %114 = vector.broadcast %113 : vector<8x1xf32> to vector<8x32xf32>
    %115 = arith.subf %105, %114 : vector<8x32xf32>
    %116 = arith.mulf %115, %115 : vector<8x32xf32>
    %cst_43 = arith.constant dense<0.000000e+00> : vector<8xf32>
    %117 = vector.multi_reduction <add>, %116, %cst_43 [1] : vector<8x32xf32> to vector<8xf32>
    %118 = vector.shape_cast %117 : vector<8xf32> to vector<8x1xf32>
    %cst_44 = arith.constant 3.200000e+01 : f32
    %119 = vector.broadcast %cst_44 : f32 to vector<8x1xf32>
    %120 = arith.divf %118, %119 : vector<8x1xf32>
    %cst_45 = arith.constant 9.99999974E-6 : f32
    %121 = vector.broadcast %cst_45 : f32 to vector<8x1xf32>
    %122 = arith.addf %120, %121 : vector<8x1xf32>
    %123 = math.rsqrt %122 : vector<8x1xf32>
    %124 = vector.broadcast %123 : vector<8x1xf32> to vector<8x32xf32>
    %125 = arith.mulf %115, %124 : vector<8x32xf32>
    %126 = vector.broadcast %107 : vector<1x32xf32> to vector<8x32xf32>
    %127 = arith.mulf %125, %126 : vector<8x32xf32>
    %128 = vector.broadcast %109 : vector<1x32xf32> to vector<8x32xf32>
    %129 = arith.addf %127, %128 : vector<8x32xf32>
    %130 = arith.truncf %129 : vector<8x32xf32> to vector<8x32xbf16>
    %c0_46 = arith.constant 0 : index
    %c0_47 = arith.constant 0 : index
    %c0_48 = arith.constant 0 : index
    %131 = vector.load %arg12[%c0_46, %c0_47, %c0_48] : memref<1x32x128xbf16, #tpu.memory_space<vmem>>, vector<1x32x128xbf16>
    %132 = vector.shape_cast %131 : vector<1x32x128xbf16> to vector<32x128xbf16>
    %cst_49 = arith.constant dense<0.000000e+00> : vector<8x128xf32>
    %133 = tpu.matmul %130, %132, %cst_49 {dimension_numbers = #tpu.dot_dimension_numbers<[1], [0], [0], [1], [0, 0, 1, 1], [], []>} : vector<8x32xbf16>, vector<32x128xbf16>, vector<8x128xf32> -> vector<8x128xf32>
    %c0_50 = arith.constant 0 : index
    %c0_51 = arith.constant 0 : index
    %c0_52 = arith.constant 0 : index
    %134 = vector.load %arg13[%c0_50, %c0_51, %c0_52] : memref<1x1x128xf32, #tpu.memory_space<vmem>>, vector<1x1x128xf32>
    %135 = vector.shape_cast %134 : vector<1x1x128xf32> to vector<1x128xf32>
    %136 = vector.broadcast %135 : vector<1x128xf32> to vector<8x128xf32>
    %137 = arith.addf %133, %136 : vector<8x128xf32>
    %cst_53 = arith.constant 5.000000e-01 : f32
    %138 = vector.broadcast %cst_53 : f32 to vector<8x128xf32>
    %139 = arith.mulf %138, %137 : vector<8x128xf32>
    %cst_54 = arith.constant 0.707106769 : f32
    %140 = vector.broadcast %cst_54 : f32 to vector<8x128xf32>
    %141 = arith.mulf %137, %140 : vector<8x128xf32>
    %142 = math.absf %141 : vector<8x128xf32>
    %cst_55 = arith.constant 0.327591091 : f32
    %143 = vector.broadcast %cst_55 : f32 to vector<8x128xf32>
    %144 = arith.mulf %143, %142 : vector<8x128xf32>
    %cst_56 = arith.constant 1.000000e+00 : f32
    %145 = vector.broadcast %cst_56 : f32 to vector<8x128xf32>
    %146 = arith.addf %145, %144 : vector<8x128xf32>
    %147 = tpu.reciprocal %146 {approx = true} : vector<8x128xf32> -> vector<8x128xf32>
    %cst_57 = arith.constant 1.06140542 : f32
    %148 = vector.broadcast %cst_57 : f32 to vector<8x128xf32>
    %149 = arith.mulf %148, %147 : vector<8x128xf32>
    %cst_58 = arith.constant 1.45315206 : f32
    %150 = vector.broadcast %cst_58 : f32 to vector<8x128xf32>
    %151 = arith.subf %149, %150 : vector<8x128xf32>
    %152 = arith.mulf %151, %147 : vector<8x128xf32>
    %cst_59 = arith.constant 1.42141378 : f32
    %153 = vector.broadcast %cst_59 : f32 to vector<8x128xf32>
    %154 = arith.addf %152, %153 : vector<8x128xf32>
    %155 = arith.mulf %154, %147 : vector<8x128xf32>
    %cst_60 = arith.constant 0.284496725 : f32
    %156 = vector.broadcast %cst_60 : f32 to vector<8x128xf32>
    %157 = arith.subf %155, %156 : vector<8x128xf32>
    %158 = arith.mulf %157, %147 : vector<8x128xf32>
    %cst_61 = arith.constant 0.254829586 : f32
    %159 = vector.broadcast %cst_61 : f32 to vector<8x128xf32>
    %160 = arith.addf %158, %159 : vector<8x128xf32>
    %161 = arith.mulf %160, %147 : vector<8x128xf32>
    %cst_62 = arith.constant 0.000000e+00 : f32
    %162 = vector.broadcast %cst_62 : f32 to vector<8x128xf32>
    %163 = arith.subf %162, %142 : vector<8x128xf32>
    %164 = arith.mulf %163, %142 : vector<8x128xf32>
    %165 = math.exp %164 : vector<8x128xf32>
    %166 = arith.mulf %161, %165 : vector<8x128xf32>
    %cst_63 = arith.constant 1.000000e+00 : f32
    %167 = vector.broadcast %cst_63 : f32 to vector<8x128xf32>
    %168 = arith.subf %167, %166 : vector<8x128xf32>
    %cst_64 = arith.constant 0.000000e+00 : f32
    %169 = vector.broadcast %cst_64 : f32 to vector<8x128xf32>
    %170 = arith.cmpf oge, %141, %169 : vector<8x128xf32>
    %cst_65 = arith.constant 0.000000e+00 : f32
    %171 = vector.broadcast %cst_65 : f32 to vector<8x128xf32>
    %172 = arith.subf %171, %168 : vector<8x128xf32>
    %173 = arith.select %170, %168, %172 : vector<8x128xi1>, vector<8x128xf32>
    %cst_66 = arith.constant 1.000000e+00 : f32
    %174 = vector.broadcast %cst_66 : f32 to vector<8x128xf32>
    %175 = arith.addf %174, %173 : vector<8x128xf32>
    %176 = arith.mulf %139, %175 : vector<8x128xf32>
    %177 = arith.truncf %176 : vector<8x128xf32> to vector<8x128xbf16>
    %c0_67 = arith.constant 0 : index
    %c0_68 = arith.constant 0 : index
    %c0_69 = arith.constant 0 : index
    %178 = vector.load %arg14[%c0_67, %c0_68, %c0_69] : memref<1x128x32xbf16, #tpu.memory_space<vmem>>, vector<1x128x32xbf16>
    %179 = vector.shape_cast %178 : vector<1x128x32xbf16> to vector<128x32xbf16>
    %cst_70 = arith.constant dense<0.000000e+00> : vector<8x32xf32>
    %180 = tpu.matmul %177, %179, %cst_70 {dimension_numbers = #tpu.dot_dimension_numbers<[1], [0], [0], [1], [0, 0, 1, 1], [], []>} : vector<8x128xbf16>, vector<128x32xbf16>, vector<8x32xf32> -> vector<8x32xf32>
    %c0_71 = arith.constant 0 : index
    %c0_72 = arith.constant 0 : index
    %c0_73 = arith.constant 0 : index
    %181 = vector.load %arg15[%c0_71, %c0_72, %c0_73] : memref<1x1x32xf32, #tpu.memory_space<vmem>>, vector<1x1x32xf32>
    %182 = vector.shape_cast %181 : vector<1x1x32xf32> to vector<1x32xf32>
    %183 = vector.broadcast %182 : vector<1x32xf32> to vector<8x32xf32>
    %184 = arith.addf %180, %183 : vector<8x32xf32>
    %185 = arith.addf %129, %184 : vector<8x32xf32>
    %c0_74 = arith.constant 0 : index
    %c0_75 = arith.constant 0 : index
    %c0_76 = arith.constant 0 : index
    %186 = vector.load %arg18[%c0_74, %c0_75, %c0_76] : memref<1x1x32xf32, #tpu.memory_space<vmem>>, vector<1x1x32xf32>
    %187 = vector.shape_cast %186 : vector<1x1x32xf32> to vector<1x32xf32>
    %c0_77 = arith.constant 0 : index
    %c0_78 = arith.constant 0 : index
    %c0_79 = arith.constant 0 : index
    %188 = vector.load %arg19[%c0_77, %c0_78, %c0_79] : memref<1x1x32xf32, #tpu.memory_space<vmem>>, vector<1x1x32xf32>
    %189 = vector.shape_cast %188 : vector<1x1x32xf32> to vector<1x32xf32>
    %cst_80 = arith.constant dense<0.000000e+00> : vector<8xf32>
    %190 = vector.multi_reduction <add>, %185, %cst_80 [1] : vector<8x32xf32> to vector<8xf32>
    %191 = vector.shape_cast %190 : vector<8xf32> to vector<8x1xf32>
    %cst_81 = arith.constant 3.200000e+01 : f32
    %192 = vector.broadcast %cst_81 : f32 to vector<8x1xf32>
    %193 = arith.divf %191, %192 : vector<8x1xf32>
    %194 = vector.broadcast %193 : vector<8x1xf32> to vector<8x32xf32>
    %195 = arith.subf %185, %194 : vector<8x32xf32>
    %196 = arith.mulf %195, %195 : vector<8x32xf32>
    %cst_82 = arith.constant dense<0.000000e+00> : vector<8xf32>
    %197 = vector.multi_reduction <add>, %196, %cst_82 [1] : vector<8x32xf32> to vector<8xf32>
    %198 = vector.shape_cast %197 : vector<8xf32> to vector<8x1xf32>
    %cst_83 = arith.constant 3.200000e+01 : f32
    %199 = vector.broadcast %cst_83 : f32 to vector<8x1xf32>
    %200 = arith.divf %198, %199 : vector<8x1xf32>
    %cst_84 = arith.constant 9.99999974E-6 : f32
    %201 = vector.broadcast %cst_84 : f32 to vector<8x1xf32>
    %202 = arith.addf %200, %201 : vector<8x1xf32>
    %203 = math.rsqrt %202 : vector<8x1xf32>
    %204 = vector.broadcast %203 : vector<8x1xf32> to vector<8x32xf32>
    %205 = arith.mulf %195, %204 : vector<8x32xf32>
    %206 = vector.broadcast %187 : vector<1x32xf32> to vector<8x32xf32>
    %207 = arith.mulf %205, %206 : vector<8x32xf32>
    %208 = vector.broadcast %189 : vector<1x32xf32> to vector<8x32xf32>
    %209 = arith.addf %207, %208 : vector<8x32xf32>
    %c0_85 = arith.constant 0 : index
    %c0_86 = arith.constant 0 : index
    %210 = vector.load %arg23[%c0_85, %c0_86] : memref<8x32xf32, #tpu.memory_space<vmem>>, vector<8x32xf32>
    tpu.vector_store %arg23[%c0_85, %c0_86], %209 {strides = array<i32>} : memref<8x32xf32, #tpu.memory_space<vmem>>, vector<8x32xf32>,
    %c1_i32 = arith.constant 1 : i32
    %211 = arith.cmpi eq, %arg1, %c1_i32 : i32
    %212 = arith.extui %211 : i1 to i32
    %c0_i32_87 = arith.constant 0 : i32
    %213 = arith.cmpi ne, %212, %c0_i32_87 : i32
    scf.if %213 {
      %214 = arith.truncf %209 : vector<8x32xf32> to vector<8x32xbf16>
      %c0_88 = arith.constant 0 : index
      %c0_89 = arith.constant 0 : index
      %215 = vector.load %arg20[%c0_88, %c0_89] : memref<32x128xbf16, #tpu.memory_space<vmem>>, vector<32x128xbf16>
      %cst_90 = arith.constant dense<0.000000e+00> : vector<8x128xf32>
      %216 = tpu.matmul %214, %215, %cst_90 {dimension_numbers = #tpu.dot_dimension_numbers<[1], [0], [0], [1], [0, 0, 1, 1], [], []>} : vector<8x32xbf16>, vector<32x128xbf16>, vector<8x128xf32> -> vector<8x128xf32>
      %c0_91 = arith.constant 0 : index
      %c0_92 = arith.constant 0 : index
      %217 = vector.load %arg21[%c0_91, %c0_92] : memref<1x128xf32, #tpu.memory_space<vmem>>, vector<1x128xf32>
      %218 = vector.broadcast %217 : vector<1x128xf32> to vector<8x128xf32>
      %219 = arith.addf %216, %218 : vector<8x128xf32>
      %220 = vector.shape_cast %219 : vector<8x128xf32> to vector<1x8x128xf32>
      %c0_93 = arith.constant 0 : index
      %c0_94 = arith.constant 0 : index
      %c0_95 = arith.constant 0 : index
      %221 = vector.load %arg22[%c0_93, %c0_94, %c0_95] : memref<1x8x128xf32, #tpu.memory_space<vmem>>, vector<1x8x128xf32>
      tpu.vector_store %arg22[%c0_93, %c0_94, %c0_95], %220 {strides = array<i32>} : memref<1x8x128xf32, #tpu.memory_space<vmem>>, vector<1x8x128xf32>,
    } else {
    }
    return
  }
  func.func @transform_0(%arg0: i32, %arg1: i32) -> (i32, i32, i32) {
    %c0_i32 = arith.constant 0 : i32
    %c0_i32_0 = arith.constant 0 : i32
    %c0_i32_1 = arith.constant 0 : i32
    return %arg0, %c0_i32, %c0_i32_0 : i32, i32, i32
  }
  func.func @transform_1(%arg0: i32, %arg1: i32) -> (i32, i32, i32) {
    %c0_i32 = arith.constant 0 : i32
    %c0_i32_0 = arith.constant 0 : i32
    %c0_i32_1 = arith.constant 0 : i32
    return %arg0, %c0_i32, %c0_i32_0 : i32, i32, i32
  }
  func.func @transform_2(%arg0: i32, %arg1: i32) -> (i32, i32) {
    %c0_i32 = arith.constant 0 : i32
    %c0_i32_0 = arith.constant 0 : i32
    %c0_i32_1 = arith.constant 0 : i32
    return %c0_i32, %c0_i32_0 : i32, i32
  }
  func.func @transform_3(%arg0: i32, %arg1: i32) -> (i32, i32) {
    %c0_i32 = arith.constant 0 : i32
    %c0_i32_0 = arith.constant 0 : i32
    %c0_i32_1 = arith.constant 0 : i32
    return %c0_i32, %c0_i32_0 : i32, i32
  }
  func.func @transform_4(%arg0: i32, %arg1: i32) -> (i32, i32) {
    %c0_i32 = arith.constant 0 : i32
    %c0_i32_0 = arith.constant 0 : i32
    %c0_i32_1 = arith.constant 0 : i32
    return %c0_i32, %c0_i32_0 : i32, i32
  }
  func.func @transform_5(%arg0: i32, %arg1: i32) -> (i32, i32) {
    %c0_i32 = arith.constant 0 : i32
    %c0_i32_0 = arith.constant 0 : i32
    %c0_i32_1 = arith.constant 0 : i32
    return %c0_i32, %c0_i32_0 : i32, i32
  }
  func.func @transform_6(%arg0: i32, %arg1: i32) -> (i32, i32, i32) {
    %c0_i32 = arith.constant 0 : i32
    %c0_i32_0 = arith.constant 0 : i32
    %c0_i32_1 = arith.constant 0 : i32
    return %arg1, %c0_i32, %c0_i32_0 : i32, i32, i32
  }
  func.func @transform_7(%arg0: i32, %arg1: i32) -> (i32, i32, i32) {
    %c0_i32 = arith.constant 0 : i32
    %c0_i32_0 = arith.constant 0 : i32
    %c0_i32_1 = arith.constant 0 : i32
    return %arg1, %c0_i32, %c0_i32_0 : i32, i32, i32
  }
  func.func @transform_8(%arg0: i32, %arg1: i32) -> (i32, i32, i32) {
    %c0_i32 = arith.constant 0 : i32
    %c0_i32_0 = arith.constant 0 : i32
    %c0_i32_1 = arith.constant 0 : i32
    return %arg1, %c0_i32, %c0_i32_0 : i32, i32, i32
  }
  func.func @transform_9(%arg0: i32, %arg1: i32) -> (i32, i32, i32) {
    %c0_i32 = arith.constant 0 : i32
    %c0_i32_0 = arith.constant 0 : i32
    %c0_i32_1 = arith.constant 0 : i32
    return %arg1, %c0_i32, %c0_i32_0 : i32, i32, i32
  }
  func.func @transform_10(%arg0: i32, %arg1: i32) -> (i32, i32, i32) {
    %c0_i32 = arith.constant 0 : i32
    %c0_i32_0 = arith.constant 0 : i32
    %c0_i32_1 = arith.constant 0 : i32
    return %arg1, %c0_i32, %c0_i32_0 : i32, i32, i32
  }
  func.func @transform_11(%arg0: i32, %arg1: i32) -> (i32, i32, i32) {
    %c0_i32 = arith.constant 0 : i32
    %c0_i32_0 = arith.constant 0 : i32
    %c0_i32_1 = arith.constant 0 : i32
    return %arg1, %c0_i32, %c0_i32_0 : i32, i32, i32
  }
  func.func @transform_12(%arg0: i32, %arg1: i32) -> (i32, i32, i32) {
    %c0_i32 = arith.constant 0 : i32
    %c0_i32_0 = arith.constant 0 : i32
    %c0_i32_1 = arith.constant 0 : i32
    return %arg1, %c0_i32, %c0_i32_0 : i32, i32, i32
  }
  func.func @transform_13(%arg0: i32, %arg1: i32) -> (i32, i32, i32) {
    %c0_i32 = arith.constant 0 : i32
    %c0_i32_0 = arith.constant 0 : i32
    %c0_i32_1 = arith.constant 0 : i32
    return %arg1, %c0_i32, %c0_i32_0 : i32, i32, i32
  }
  func.func @transform_14(%arg0: i32, %arg1: i32) -> (i32, i32, i32) {
    %c0_i32 = arith.constant 0 : i32
    %c0_i32_0 = arith.constant 0 : i32
    %c0_i32_1 = arith.constant 0 : i32
    return %arg1, %c0_i32, %c0_i32_0 : i32, i32, i32
  }
  func.func @transform_15(%arg0: i32, %arg1: i32) -> (i32, i32, i32) {
    %c0_i32 = arith.constant 0 : i32
    %c0_i32_0 = arith.constant 0 : i32
    %c0_i32_1 = arith.constant 0 : i32
    return %arg1, %c0_i32, %c0_i32_0 : i32, i32, i32
  }
  func.func @transform_16(%arg0: i32, %arg1: i32) -> (i32, i32, i32) {
    %c0_i32 = arith.constant 0 : i32
    %c0_i32_0 = arith.constant 0 : i32
    %c0_i32_1 = arith.constant 0 : i32
    return %arg1, %c0_i32, %c0_i32_0 : i32, i32, i32
  }
  func.func @transform_17(%arg0: i32, %arg1: i32) -> (i32, i32, i32) {
    %c0_i32 = arith.constant 0 : i32
    %c0_i32_0 = arith.constant 0 : i32
    %c0_i32_1 = arith.constant 0 : i32
    return %arg1, %c0_i32, %c0_i32_0 : i32, i32, i32
  }
  func.func @transform_18(%arg0: i32, %arg1: i32) -> (i32, i32) {
    %c0_i32 = arith.constant 0 : i32
    %c0_i32_0 = arith.constant 0 : i32
    %c0_i32_1 = arith.constant 0 : i32
    return %c0_i32, %c0_i32_0 : i32, i32
  }
  func.func @transform_19(%arg0: i32, %arg1: i32) -> (i32, i32) {
    %c0_i32 = arith.constant 0 : i32
    %c0_i32_0 = arith.constant 0 : i32
    %c0_i32_1 = arith.constant 0 : i32
    return %c0_i32, %c0_i32_0 : i32, i32
  }
  func.func @transform_20(%arg0: i32, %arg1: i32) -> (i32, i32, i32) {
    %c0_i32 = arith.constant 0 : i32
    %c0_i32_0 = arith.constant 0 : i32
    %c0_i32_1 = arith.constant 0 : i32
    return %arg0, %c0_i32, %c0_i32_0 : i32, i32, i32
  }
}

</mosaic_0001>

<bundles_post_ra>
// kernel: tpu_custom_call.1
= control target key start
LH: loop header
LB: loop body
LE: loop exit
PB: predicated region body
PF: predicated region fallthrough
CT: control target
= control target key end

     0   :  { %s3200_s0 = inlined_call_operand.vmem [shape: f32[2,8,32], index: 0, kind: input, shape index: {}]   ;;  %s3201_s1 = inlined_call_operand.vmem [shape: f32[2,1,32], index: 1, kind: input, shape index: {}]   ;;  %s3202_s2 = inlined_call_operand.vmem [shape: bf16[32,128], index: 2, kind: input, shape index: {}]   ;;  %s3203_s3 = inlined_call_operand.vmem [shape: f32[1,128], index: 3, kind: input, shape index: {}]   ;;  %s3204_s4 = inlined_call_operand.vmem [shape: bf16[128,32], index: 4, kind: input, shape index: {}]   ;;  %s3205_s5 = inlined_call_operand.vmem [shape: f32[1,32], index: 5, kind: input, shape index: {}]   ;;  %s3206_s6 = inlined_call_operand.vmem [shape: bf16[2,32,96], index: 6, kind: input, shape index: {}]   ;;  %s3207_s7 = inlined_call_operand.vmem [shape: f32[2,1,96], index: 7, kind: input, shape index: {}]   ;;  %s3208_s8 = inlined_call_operand.vmem [shape: bf16[2,32,32], index: 8, kind: input, shape index: {}]   ;;  %s3209_s9 = inlined_call_operand.vmem [shape: f32[2,1,32], index: 9, kind: input, shape index: {}]   ;;  %s3210_s10 = inlined_call_operand.vmem [shape: bf16[2,32,128], index: 10, kind: input, shape index: {}]   ;;  %s3211_s11 = inlined_call_operand.vmem [shape: f32[2,1,128], index: 11, kind: input, shape index: {}]   ;;  %s3212_s12 = inlined_call_operand.vmem [shape: bf16[2,128,32], index: 12, kind: input, shape index: {}]   ;;  %s3213_s13 = inlined_call_operand.vmem [shape: f32[2,1,32], index: 13, kind: input, shape index: {}]   ;;  %s3214_s14 = inlined_call_operand.vmem [shape: f32[2,1,32], index: 14, kind: input, shape index: {}]   ;;  %s3215_s15 = inlined_call_operand.vmem [shape: f32[2,1,32], index: 15, kind: input, shape index: {}]   ;;  %s3216_s16 = inlined_call_operand.vmem [shape: f32[2,1,32], index: 16, kind: input, shape index: {}]   ;;  %s3217_s17 = inlined_call_operand.vmem [shape: f32[2,1,32], index: 17, kind: input, shape index: {}]   ;;  %s3218_s18 = inlined_call_operand.vmem [shape: bf16[32,128], index: 18, kind: input, shape index: {}]   ;;  %s3219_s19 = inlined_call_operand.vmem [shape: f32[1,128], index: 19, kind: input, shape index: {}]   ;;  %s3220_s20 = inlined_call_operand.hbm [shape: f32[2,8,128], index: 20, kind: output, shape index: {}]  }
   0x1   :  { %3240 = sst [smem:[#allocation20_spill]] %s3200_s0 }
   0x2   :  { %3241 = sst [smem:[#allocation21_spill]] %s3201_s1 }
   0x3   :  { %3242 = sst [smem:[#allocation22_spill]] %s3202_s2 }
   0x4   :  { %3243 = sst [smem:[#allocation23_spill]] %s3203_s3 }
   0x5   :  { %3244 = sst [smem:[#allocation24_spill]] %s3204_s4 }
   0x6   :  { %3245 = sst [smem:[#allocation25_spill]] %s3205_s5 }
   0x7   :  { %3246 = sst [smem:[#allocation26_spill]] %s3206_s6 }
   0x8   :  { %3247 = sst [smem:[#allocation27_spill]] %s3208_s8 }
   0x9   :  { %3248 = sst [smem:[#allocation28_spill]] %s3210_s10 }
   0xa   :  { %3249 = sst [smem:[#allocation29_spill]] %s3213_s13 }
   0xb   :  { %3250 = sst [smem:[#allocation30_spill]] %s3217_s17 }
   0xc   :  { %3251 = sst [smem:[#allocation31_spill]] %s3218_s18 }
   0xd   :  { %3252 = sst [smem:[#allocation32_spill]] %s3219_s19 }
   0xe   :  { %3253 = sst [smem:[#allocation33_spill]] %s3220_s20 }
   0xf   :  { %25 = vsyncpa [#allocation4], 0 }
  0x10   :  { %27 = vsyncpa [#allocation4 + $0x1], 0  ;;  %s2799_s1 = smov 0   ;;  %s2801_s22 = smov 0  }
  0x11   :  { %s2803_s23 = smov 0   ;;  %s2805_s24 = smov 0  }
  0x12   :  { %s2807_s2 = smov 0   ;;  %s2809_s25 = smov 0  }
  0x13   :  { %s2811_s3 = smov 0   ;;  %s2813_s26 = smov 0  }
  0x14 LB: > { %3254 = sst [smem:[#allocation6_spill]] %s2643_s1  ;;  %s2181_s27 = sadd.s32 4294967295, %s2671_s26   ;;  %s2671_s26 = sphi %s2813_s26, %s33_s26   ;;  %s2667_s3 = sphi %s2811_s3, %s3309_s3   ;;  %s2663_s25 = sphi %s2809_s25, %s3308_s25   ;;  %s2659_s2 = sphi %s2807_s2, %s3307_s2   ;;  %s2655_s24 = sphi %s2805_s24, %s3306_s24   ;;  %s2651_s23 = sphi %s2803_s23, %s3305_s23   ;;  %s2647_s22 = sphi %s2801_s22, %s3304_s22   ;;  %s2643_s1 = sphi %s2799_s1, %s3303_s1  }
  0x15   : > { %3255 = sst [smem:[#allocation7_spill]] %s2647_s22  ;;  %s2182_s28 = sadd.s32 4294967294, %s2671_s26  }
  0x16   : > { %3256 = sst [smem:[#allocation8_spill]] %s2651_s23  ;;  %s42_s4 = sadd.s32 1, %s2663_s25 }
  0x17   : > { %3257 = sst [smem:[#allocation9_spill]] %s2655_s24  ;;  %p43_p0 = scmp.ge.s32.totalorder %s42_s4, 2 }
  0x18   : > { %3258 = sst [smem:[#allocation10_spill]] %s2659_s2  ;;  %s45_s29 = sadd.s32 1, %s2667_s3 }
  0x19   : > { %3259 = sst [smem:[#allocation11_spill]] %s2663_s25  ;;  %p552_p1 = scmp.ne.s32.totalorder %s2651_s23, %s2647_s22 }
  0x1a   : > { %3260 = sst [smem:[#allocation12_spill]] %s2667_s3  ;;  %p553_p2 = scmp.eq.s32.totalorder %s2181_s27, 3 }
  0x1b   : > { %3261 = sst [smem:[#allocation13_spill]] %s2671_s26  ;;  %s3311_s4 = smov (%p43_p0, %s42_s4), 0 }
  0x1c   : > { %3262 = sst [smem:[#allocation14_spill]] %s3311_s4  ;;  %s3313_s29 = smov (!%p43_p0, %s45_s29), %s2667_s3 }
  0x1d   : > { %p2848_p3 = por %p553_p2, %p552_p1  ;;  %p558_p4 = scmp.ne.s32.totalorder %s2647_s22, %s2643_s1 }
  0x1e   : > { %p47_p5 = scmp.ge.s32.totalorder %s3313_s29, 2  ;;  %p559_p6 = scmp.eq.s32.totalorder %s2182_s28, 3 }
  0x1f   : > { %s3263_s30 = scalar_select %p2848_p3, 1, 0 }
  0x20   : > { %p2185_p7 = scmp.ge.s32.totalorder %s2671_s26, 1  ;;  %p688_p8 = scmp.lt.s32.totalorder %s2671_s26, 5 }
  0x21   : > { %3264 = sst [smem:[#allocation15_spill]] %s3263_s30  ;;  %s3315_s29 = smov (%p47_p5, %s3313_s29), 0 }
  0x22   : > { %3265 = sst [smem:[#allocation16_spill]] %s3315_s29  ;;  %p2858_p9 = por %p559_p6, %p558_p4 }
  0x23   : > { %p689_p10 = pnand %p2185_p7, %p688_p8  ;;  %s539_s21 = ssub.s32 %s2667_s3, %s3315_s29 }
  0x24   : > { %s3266_s0 = scalar_select %p2858_p9, 1, 0 }
  0x25   : > { %s542_s27 = sadd.s32 1, %s2651_s23  ;;  %p540_p11 = scmp.eq.s32.totalorder %s539_s21, 0 }
  0x26   : > { %3267 = sst [smem:[#allocation17_spill]] %s3266_s0  ;;  %692 = sbr.rel (%p689_p10) target bundleno = 3207 (0xc87), region = 100 }
  0x27   : > { %s2866_s4 = scalar_select %p540_p11, %s2651_s23, %s542_s27  }
  0x29   : > { %3268 = sst [smem:[#allocation18_spill]] %s2866_s4 }
  0x2b   : > { %s3226_s28 = sand.u32 1, %s2647_s22   ;;  %p792_p12 = scmp.lt.s32.totalorder %s2659_s2, 1 }
  0x2c   : > { %s2872_s25 = sshll.u32 %s3226_s28, 3  ;;  %p799_p13 = scmp.lt.s32.totalorder %s2655_s24, 1 }
  0x2d   : > { %s2876_s0 = scalar_select %p792_p12, %s2659_s2, 1 }
  0x2e   : > { %s2879_s21 = scalar_select %p799_p13, %s2655_s24, 1 }
  0x2f   : > { %s2187_s27 = sshll.u32 %s2876_s0, 3  ;;  %s3269_s3 = sld [smem:[#allocation21_spill]] }
  0x30   : > { %s3270_s26 = sld [smem:[#allocation20_spill]]  ;;  %s2253_s30 = sshll.u32 %s2879_s21, 4 }
  0x31   : > { %s3271_s6 = sld [smem:[#allocation26_spill]]  ;;  %s2256_s5 = sshll.u32 %s2879_s21, 6 }
  0x32   : > { %s3272_s8 = sld [smem:[#allocation27_spill]]  ;;  %s836_s23 = scalar_lea.vmem %s3215_s15, %s2879_s21 }
  0x33   : > { %s3274_s10 = sld [smem:[#allocation28_spill]]  ;;  %s791_s13 = scalar_lea.vmem [#allocation3], %s2872_s25 }
  0x34   : > { %s3276_s18 = sld [smem:[#allocation30_spill]] }
  0x35   : > { %s798_s4 = scalar_lea.vmem %s3269_s3, %s2876_s0 }
  0x36   : > { %s2889_s20 = scalar_lea.vmem %s3270_s26, %s2187_s27  ;;  %s833_s26 = scalar_lea.vmem %s3214_s14, %s2879_s21 }
  0x37   : > { %s2895_s19 = scalar_lea.vmem %s3271_s6, %s2253_s30  ;;  %s839_s6 = scalar_lea.vmem %s3216_s16, %s2879_s21 }
  0x38   : > { %s2904_s3 = scalar_lea.vmem %s3272_s8, %s2253_s30  ;;  %s3277_s8 = sld [smem:[#allocation9_spill]] }
  0x39   : > { %3273 = sst [smem:[#allocation19_spill]] %s2904_s3  ;;  %s2913_s27 = scalar_lea.vmem %s3274_s10, %s2253_s30 }
  0x3a   : > { %s2927_s3 = scalar_lea.vmem %s3212_s12, %s2256_s5  ;;  %s842_s17 = scalar_lea.vmem %s3276_s18, %s2879_s21 }
  0x3e   : > { %p2196_p0 = scmp.ne.s32.totalorder %s3277_s8, 0 }
  0x3f   : > { %s3278_s0 = sld [smem:[#allocation22_spill]] (!%p2196_p0) }
  0x40   : > { %847 = sbr.rel (%p2196_p0) target bundleno = 509 (0x1fd), region = 104  ;;  %s3279_s22 = sld [smem:[#allocation24_spill]] (!%p2196_p0) }
  0x41   : > { %s3281_s29 = sld [smem:[#allocation23_spill]] (!%p2196_p0) }
  0x42   : > { %s3282_s10 = sld [smem:[#allocation25_spill]] (!%p2196_p0) }
  0x45   : > { %v2525_v0 = vld [vmem:[%s3278_s0 + $0x8] sm:$0xff]   ;;  %v2673_v1 = vmov 0.0   ;;  %v2526_v2 = vld [vmem:[%s3278_s0] sm:$0xff]   ;;  %vm2674_vm0 = vmmov 0   ;;  %vm867_vm1 = vcmask 261120   ;;  %v1025_v25 = vlaneseq }
  0x46   : > { %2306 = vmatprep.subr.bf16.mxu0 %v2673_v1  ;;  %2314 = vmatprep.subr.bf16.mxu1 %v2673_v1  ;;  %v848_v3 = vld [vmem:[%s798_s4] sm:$0x1]  ;;  %s3280_s18 = smov %s3279_s22  ;;  %v2527_v5 = vld [vmem:[%s3279_s22 + $0x38] sm:$0xff]  }
  0x47   : > { %2307 = vmatpush3.bf16.msra.mxu0 %v2525_v0  ;;  %2310 = vmatprep.mubr.msk.bf16.mxu0 %vm2674_vm0, %v2673_v1  ;;  %v849_v4 = vpack.c.bf16 %v848_v3, %v848_v3  ;;  %v2528_v6 = vld [vmem:[%s3280_s18 + $0x30] sm:$0xff]   ;;  %v2529_v7 = vld [vmem:[%s3280_s18 + $0x28] sm:$0xff]   ;;  %v2530_v8 = vld [vmem:[%s3280_s18 + $0x20] sm:$0xff]   ;;  %v1026_v26 = vshrl.u32 %v1025_v25, 7 }
  0x48   : > { %2308 = vmatprep.subr.bf16.mxu0 %v2673_v1  ;;  %2330 = vmatprep.mubr.msk.bf16.mxu1 %vm2674_vm0, %v2673_v1  ;;  %v2531_v9 = vld [vmem:[%s3280_s18 + $0x18] sm:$0xff]   ;;  %v2532_v10 = vld [vmem:[%s3280_s18 + $0x10] sm:$0xff]   ;;  %v2533_v11 = vld [vmem:[%s3280_s18 + $0x8] sm:$0xff]  }
  0x49   : > { %2315 = vmatpush3.bf16.msra.mxu1 %v2527_v5  ;;  %v2534_v12 = vld [vmem:[%s3280_s18] sm:$0xff]   ;;  %v1027_v28 = vsub.s32 0, %v1026_v26 }
  0x4a   : > { %2316 = vmatprep.subr.bf16.mxu1 %v2673_v1  ;;  %v854_v13 = vld [vmem:[%s3281_s29] sm:$0x1] }
  0x4b   : > { %2309 = vmatpush3.bf16.msra.mxu0 %v2526_v2  ;;  %v935_v27 = vld [vmem:[%s3282_s10] sm:$0x1] }
  0x4c   : > { %v1024_v31 = vld [vmem:[%s2889_s20] sm:$0xff] }
  0x4d   : > { %2317 = vmatpush3.bf16.msra.mxu1 %v2528_v6 }
  0x4e   : > { %2311 = vmatmul.mubr.msk.bf16.vlgmr.msra.gmra.mxu0 %vm867_vm1, %v849_v4  ;;  %2318 = vmatprep.subr.bf16.mxu1 %v2673_v1 }
  0x51   : > { %2319 = vmatpush3.bf16.msra.mxu1 %v2529_v7 }
  0x52   : > { %2320 = vmatprep.subr.bf16.mxu1 %v2673_v1 }
  0x55   : > { %2321 = vmatpush3.bf16.msra.mxu1 %v2530_v8 }
  0x56   : > { %2322 = vmatprep.subr.bf16.mxu1 %v2673_v1 }
  0x59   : > { %2323 = vmatpush3.bf16.msra.mxu1 %v2531_v9 }
  0x5a   : > { %2324 = vmatprep.subr.bf16.mxu1 %v2673_v1 }
  0x5d   : > { %2325 = vmatpush3.bf16.msra.mxu1 %v2532_v10 }
  0x5e   : > { %2326 = vmatprep.subr.bf16.mxu1 %v2673_v1 }
  0x61   : > { %2327 = vmatpush3.bf16.msra.mxu1 %v2533_v11 }
  0x62   : > { %2328 = vmatprep.subr.bf16.mxu1 %v2673_v1 }
  0x65   : > { %2329 = vmatpush3.bf16.msra.mxu1 %v2534_v12 }
 0x10e   : > { %v905_v14 = vpop.f32.mrf.mxu0 }
 0x10f   : > { %v906_v15 = vadd.f32 %v905_v14, %v854_v13 }
 0x110   : > { %v2312_v16 = vpop.f32.mrf.mxu0 }
 0x111   : > { %v2200_v17 = vmul.f32 -1.442695, %v906_v15 }
 0x112   : > { %v908_v18 = vpop.f32.mrf.mxu0 }
 0x113   : > { %2535 = vpow2.f32 %v2200_v17 }
 0x114   : > { %v2313_v19 = vpop.f32.mrf.mxu0 }
 0x120   : > { %v2536_v20 = vpop.eup %2535 }
 0x121   : > { %v914_v21 = vadd.f32 1.0, %v2536_v20 }
 0x123   : > { %2537 = vrcp.f32 %v914_v21 }
 0x130   : > { %v2538_v22 = vpop.eup %2537 }
 0x131   : > { %v917_v23 = vmul.f32 %v2538_v22, %v906_v15 }
 0x133   : > { %v918_v24 = vpack.c.bf16 %v917_v23, %v917_v23 }
 0x135   : > { %2331 = vmatmul.mubr.bf16.vlgmr.msra.gmra.mxu1 %v918_v24 }
 0x1f5   : > { %v1018_v29 = vpop.f32.mrf.mxu1 }
 0x1f6   : > { %v1019_v30 = vadd.f32 %v1018_v29, %v935_v27 }
 0x1f7   : > { %v2332_v32 = vpop.f32.mrf.mxu1 }
 0x1f8   : > { %v1028_v33 = vrot.slane %v1019_v30, %v1027_v28 }
 0x1f9   : > { %v1021_v34 = vpop.f32.mrf.mxu1 }
 0x1fa   : > { %v1029_v35 = vadd.f32 %v1028_v33, %v1024_v31 }
 0x1fb   : > { %v2333_v36 = vpop.f32.mrf.mxu1 }
 0x1fc   : > { %1030 = vst.msk [vmem:[#allocation2] sm:$0xff] %vm867_vm1, %v1029_v35 }
 0x1fd PF: > { %v2539_v37 = vld [vmem:[%s2895_s19 + $0x8] sm:$0xff]   ;;  %v2675_v38 = vmov 0.0   ;;  %v2540_v39 = vld [vmem:[%s2895_s19] sm:$0xff]   ;;  %vm2676_vm2 = vmmov 0   ;;  %vm1056_vm3 = vcmask 261120   ;;  %s3283_s28 = scalar_lea.vmem %s3207_s7, %s2879_s21  ;;  %s2677_s22 = smov 96  }
 0x1fe   : > { %2334 = vmatprep.subr.bf16.mxu0 %v2675_v38  ;;  %2354 = vmatprep.subr.bf16.mxu1 %v2675_v38  ;;  %v2209_v42 = vld [vmem:[%s3283_s28] ss:$0 sm:$0xff]  ;;  %s2678_s2 = smov 120   ;;  %s2679_s24 = smov 88   ;;  %vm1106_vm4 = vcmask 64512   ;;  %vm1170_vm5 = vcmask 1043456  }
 0x1ff   : > { %2335 = vmatpush3.bf16.msra.mxu0 %v2539_v37  ;;  %2338 = vmatprep.mubr.msk.bf16.mxu0 %vm2676_vm2, %v2675_v38  ;;  %s2680_s4 = smov 80   ;;  %s2681_s8 = smov 112   ;;  %vm1558_vm6 = vcmask 130048   ;;  %vm1560_vm7 = vcmask 195584  }
 0x200   : > { %2336 = vmatprep.subr.bf16.mxu0 %v2675_v38  ;;  %2356 = vmatprep.mubr.msk.bf16.mxu1 %vm2676_vm2, %v2675_v38  ;;  %s2682_s5 = smov 72   ;;  %s2683_s29 = smov 104  }
 0x201   : > { %s2684_s1 = smov 56   ;;  %s2685_s30 = smov 64  }
 0x202   : > { %s2686_s10 = smov 40   ;;  %s2687_s19 = smov 48  }
 0x203   : > { %v2992_v40 = vld [vmem:[#allocation2] sm:$0xff]  ;;  %2337 = vmatpush3.bf16.msra.mxu0 %v2540_v39  ;;  %s3284_s20 = sld [smem:[#allocation19_spill]]  ;;  %s2688_s28 = smov 8  }
 0x204   : > { %v1032_v41 = vpack.c.bf16 %v2992_v40, %v2992_v40  ;;  %2342 = vmatprep.subr.bf16.mxu0 %v2675_v38 }
 0x206   : > { %2339 = vmatmul.mubr.msk.bf16.vlgmr.msra.gmra.mxu0 %vm1056_vm3, %v1032_v41 }
 0x207   : > { %2344 = vmatprep.mubr.msk.bf16.mxu0 %vm2676_vm2, %v2675_v38 }
 0x2c6   : > { %v1094_v43 = vpop.f32.mrf.mxu0 }
 0x2c7   : > { %v1095_v44 = vadd.f32 %v2209_v42, %v1094_v43 }
 0x2c8   : > { %v2340_v45 = vpop.f32.mrf.mxu0 }
 0x2c9   : > { %v1100_v46 = vmul.f32 0.35355338, %v1095_v44  ;;  %v3008_v47 = vpack.c.bf16 %v1095_v44, %v1095_v44 }
 0x2ca   : > { %v1097_v48 = vpop.f32.mrf.mxu0 }
 0x2cb   : > { %v1101_v49 = vpack.c.bf16 %v1100_v46, %v1100_v46  ;;  %1104 = vrot.lane.b32.xlu0 %v3008_v47, %s2677_s22  ;;  %s2689_s22 = smov 16  }
 0x2cc   : > { %v2341_v50 = vpop.f32.mrf.mxu0 }
 0x2cd   : > { %1215 = vrot.lane.b32.xlu1 %v1101_v49, %s2678_s2  ;;  %s2690_s2 = smov 24  }
 0x2cf   : > { %1217 = vrot.lane.b32.xlu0 %v3008_v47, %s2679_s24 }
 0x2d1   : > { %1327 = vrot.lane.b32.xlu1 %v3008_v47, %s2680_s4 }
 0x2d3   : > { %1325 = vrot.lane.b32.xlu0 %v1101_v49, %s2681_s8  ;;  %s3285_s8 = scalar_lea.vmem %s3209_s9, %s2879_s21 }
 0x2d5   : > { %1437 = vrot.lane.b32.xlu1 %v3008_v47, %s2682_s5 }
 0x2d7   : > { %1435 = vrot.lane.b32.xlu0 %v1101_v49, %s2683_s29 }
 0x33d   : > { %v1105_v51 = vpop.permute.xlu0 %1104 }
 0x33e   : > { %v1111_v52 = vsel %vm1106_vm4, %v1105_v51, 0 }
 0x33f   : > { %2343 = vmatpush3.bf16.xpose.msra.mxu0 %v1111_v52  ;;  %v1216_v53 = vpop.permute.xlu1 %1215 }
 0x340   : > { %2348 = vmatprep.subr.bf16.mxu0 %v2675_v38 }
 0x341   : > { %v1218_v54 = vpop.permute.xlu0 %1217 }
 0x342   : > { %v1223_v55 = vsel %vm1106_vm4, %v1218_v54, 0 }
 0x343   : > { %2355 = vmatpush3.bf16.xpose.msra.mxu1 %v1223_v55  ;;  %v1328_v56 = vpop.permute.xlu1 %1327 }
 0x344   : > { %2366 = vmatprep.subr.bf16.mxu1 %v2675_v38  ;;  %v1333_v57 = vsel %vm1106_vm4, %v1328_v56, 0 }
 0x345   : > { %v1326_v59 = vpop.permute.xlu0 %1325 }
 0x346   : > { %2345 = vmatmul.mubr.msk.bf16.vlgmr.msra.gmra.mxu0 %vm1106_vm4, %v1101_v49 }
 0x347   : > { %2350 = vmatprep.mubr.msk.bf16.mxu0 %vm2676_vm2, %v2675_v38  ;;  %v1438_v58 = vpop.permute.xlu1 %1437 }
 0x348   : > { %v1443_v60 = vsel %vm1106_vm4, %v1438_v58, 0 }
 0x349   : > { %v1436_v61 = vpop.permute.xlu0 %1435 }
 0x34a   : > { %2357 = vmatmul.mubr.msk.bf16.vlgmr.msra.gmra.mxu1 %vm1106_vm4, %v1216_v53 }
 0x34b   : > { %2367 = vmatpush3.bf16.xpose.msra.mxu1 %v1333_v57  ;;  %2368 = vmatprep.mubr.msk.bf16.mxu1 %vm2676_vm2, %v2675_v38 }
 0x34c   : > { %2378 = vmatprep.subr.bf16.mxu1 %v2675_v38 }
 0x352   : > { %2369 = vmatmul.mubr.msk.bf16.vlgmr.msra.gmra.mxu1 %vm1106_vm4, %v1326_v59 }
 0x353   : > { %2379 = vmatpush3.bf16.xpose.msra.mxu1 %v1443_v60  ;;  %2380 = vmatprep.mubr.msk.bf16.mxu1 %vm2676_vm2, %v2675_v38 }
 0x354   : > { %2390 = vmatprep.subr.bf16.mxu1 %v2675_v38 }
 0x35a   : > { %2381 = vmatmul.mubr.msk.bf16.vlgmr.msra.gmra.mxu1 %vm1106_vm4, %v1436_v61 }
 0x35b   : > { %2394 = vmatprep.mubr.msk.bf16.mxu1 %vm2676_vm2, %v2675_v38 }
 0x406   : > { %v1147_v62 = vpop.f32.mrf.mxu0 }
 0x407   : > { %v1153_v63 = vsel %vm1106_vm4, %v1147_v62, -inf }
 0x408   : > { %1154 = vmax.xlane.f32.xlu1 %v1153_v63  ;;  %v2346_v0 = vpop.f32.mrf.mxu0 }
 0x40a   : > { %v1150_v1 = vpop.f32.mrf.mxu0  ;;  %v1259_v2 = vpop.f32.mrf.mxu1 }
 0x40b   : > { %v1265_v3 = vsel %vm1106_vm4, %v1259_v2, -inf }
 0x40c   : > { %1266 = vmax.xlane.f32.xlu0 %v1265_v3  ;;  %v2347_v4 = vpop.f32.mrf.mxu0  ;;  %v2358_v5 = vpop.f32.mrf.mxu1 }
 0x40e   : > { %v1262_v6 = vpop.f32.mrf.mxu1 }
 0x410   : > { %v2359_v7 = vpop.f32.mrf.mxu1 }
 0x412   : > { %v1369_v8 = vpop.f32.mrf.mxu1 }
 0x413   : > { %v1375_v9 = vsel %vm1106_vm4, %v1369_v8, -inf }
 0x414   : > { %1376 = vmax.xlane.f32.xlu0 %v1375_v9  ;;  %v2370_v10 = vpop.f32.mrf.mxu1  ;;  %v2542_v9 = vld [vmem:[%s3284_s20] sm:$0xff]  }
 0x416   : > { %v1372_v11 = vpop.f32.mrf.mxu1 }
 0x418   : > { %v2371_v12 = vpop.f32.mrf.mxu1 }
 0x41a   : > { %v1479_v13 = vpop.f32.mrf.mxu1 }
 0x41b   : > { %v1485_v14 = vsel %vm1106_vm4, %v1479_v13, -inf }
 0x41c   : > { %v2382_v15 = vpop.f32.mrf.mxu1  ;;  %1486 = vmax.xlane.f32.xlu1 %v1485_v14 }
 0x41e   : > { %v1482_v16 = vpop.f32.mrf.mxu1 }
 0x420   : > { %v2383_v17 = vpop.f32.mrf.mxu1 }
 0x491   : > { %v1155_v18 = vpop.xlane.xlu1 %1154 }
 0x492   : > { %v1156_v19 = vsub.f32 %v1147_v62, %v1155_v18 }
 0x494   : > { %v1157_v20 = vmul.f32 1.442695, %v1156_v19 }
 0x495   : > { %v1267_v21 = vpop.xlane.xlu0 %1266 }
 0x496   : > { %2553 = vpow2.f32 %v1157_v20  ;;  %v1268_v22 = vsub.f32 %v1259_v2, %v1267_v21 }
 0x498   : > { %v1269_v23 = vmul.f32 1.442695, %v1268_v22 }
 0x49a   : > { %2555 = vpow2.f32 %v1269_v23 }
 0x49d   : > { %v1377_v24 = vpop.xlane.xlu0 %1376 }
 0x49e   : > { %v1378_v25 = vsub.f32 %v1369_v8, %v1377_v24  ;;  %v2541_v8 = vld [vmem:[%s3284_s20 + $0x8] sm:$0xff]  }
 0x49f   : > { %2391 = vmatpush3.bf16.msra.mxu1 %v2541_v8 }
 0x4a0   : > { %v1379_v26 = vmul.f32 1.442695, %v1378_v25  ;;  %2392 = vmatprep.subr.bf16.mxu1 %v2675_v38  ;;  %v2221_v25 = vld [vmem:[%s3285_s8] ss:$0 sm:$0xff]  ;;  %s3290_s8 = sld [smem:[#allocation9_spill]] }
 0x4a2   : > { %2557 = vpow2.f32 %v1379_v26 }
 0x4a3   : > { %v2554_v27 = vpop.eup %2553  ;;  %2393 = vmatpush3.bf16.msra.mxu1 %v2542_v9 }
 0x4a4   : > { %v1159_v28 = vsel %vm1106_vm4, %v2554_v27, 0.0  ;;  %2406 = vmatprep.subr.bf16.mxu1 %v2675_v38 }
 0x4a5   : > { %1160 = vadd.xlane.f32.xlu0 %v1159_v28  ;;  %v1487_v33 = vpop.xlane.xlu1 %1486 }
 0x4a6   : > { %v1488_v34 = vsub.f32 %v1479_v13, %v1487_v33  ;;  %p2244_p1 = scmp.ne.s32.totalorder %s3290_s8, 1 }
 0x4a7   : > { %v2556_v29 = vpop.eup %2555 }
 0x4a8   : > { %v1271_v30 = vsel %vm1106_vm4, %v2556_v29, 0.0  ;;  %v1489_v35 = vmul.f32 1.442695, %v1488_v34 }
 0x4a9   : > { %1272 = vadd.xlane.f32.xlu1 %v1271_v30 }
 0x4aa   : > { %2559 = vpow2.f32 %v1489_v35 }
 0x4af   : > { %v2558_v31 = vpop.eup %2557 }
 0x4b0   : > { %v1381_v32 = vsel %vm1106_vm4, %v2558_v31, 0.0 }
 0x4b1   : > { %1382 = vadd.xlane.f32.xlu0 %v1381_v32 }
 0x4b7   : > { %v2560_v36 = vpop.eup %2559 }
 0x4b8   : > { %v1491_v37 = vsel %vm1106_vm4, %v2560_v36, 0.0 }
 0x4ba   : > { %1277 = vrot.lane.b32.xlu1 %v3008_v47, %s2684_s1  ;;  %s3291_s1 = sld [smem:[#allocation31_spill]] (!%p2244_p1) }
 0x4c7   : > { %1165 = vrot.lane.b32.xlu0 %v3008_v47, %s2685_s30  ;;  %s3292_s30 = smov (!%p2244_p1), %s3291_s1 }
 0x4cb   : > { %1497 = vrot.lane.b32.xlu0 %v3008_v47, %s2686_s10 }
 0x4de   : > { %1492 = vadd.xlane.f32.xlu1 %v1491_v37 }
 0x4ef   : > { %1387 = vrot.lane.b32.xlu1 %v3008_v47, %s2687_s19  ;;  %s3287_s19 = sld [smem:[#allocation29_spill]] }
 0x4f5   : > { %s3288_s20 = scalar_lea.vmem %s3287_s19, %s2879_s21 }
 0x52e   : > { %v1161_v39 = vpop.xlane.xlu0 %1160 }
 0x52f   : > { %2561 = vrcp.f32 %v1161_v39  ;;  %v2543_v39 = vld [vmem:[%s2913_s27 + $0x8] sm:$0xff]  }
 0x532   : > { %v1273_v41 = vpop.xlane.xlu1 %1272 }
 0x533   : > { %2563 = vrcp.f32 %v1273_v41  ;;  %v2544_v41 = vld [vmem:[%s2913_s27] sm:$0xff]   ;;  %s3293_s27 = sld [smem:[#allocation32_spill]] (!%p2244_p1) }
 0x536   : > { %v1278_v48 = vpop.permute.xlu1 %1277 }
 0x537   : > { %v1283_v51 = vsel %vm1170_vm5, %v1278_v48, 0  ;;  %v2226_v48 = vld [vmem:[%s836_s23] ss:$0 sm:$0xff] }
 0x53a   : > { %v1383_v42 = vpop.xlane.xlu0 %1382 }
 0x53b   : > { %2565 = vrcp.f32 %v1383_v42 }
 0x53c   : > { %v2562_v43 = vpop.eup %2561 }
 0x53d   : > { %v1163_v44 = vmul.f32 %v2562_v43, %v2554_v27 }
 0x53e   : > { %v1166_v45 = vpop.permute.xlu0 %1165 }
 0x53f   : > { %v1172_v46 = vsel %vm1170_vm5, %v1166_v45, 0  ;;  %v1164_v49 = vpack.c.bf16 %v1163_v44, %v1163_v44  ;;  %v2225_v45 = vld [vmem:[%s833_s26] ss:$0 sm:$0xff]  ;;  %s3286_s26 = scalar_lea.vmem %s3211_s11, %s2879_s21 }
 0x540   : > { %2349 = vmatpush3.bf16.msra.mxu0 %v1172_v46  ;;  %v2564_v50 = vpop.eup %2563 }
 0x541   : > { %2360 = vmatprep.subr.bf16.mxu0 %v2675_v38  ;;  %v1275_v47 = vmul.f32 %v2564_v50, %v2556_v29 }
 0x542   : > { %v1498_v58 = vpop.permute.xlu0 %1497 }
 0x543   : > { %2351 = vmatmul.mubr.msk.bf16.vlgmr.msra.gmra.mxu0 %vm1106_vm4, %v1164_v49  ;;  %v1276_v52 = vpack.c.bf16 %v1275_v47, %v1275_v47  ;;  %v1503_v60 = vsel %vm1170_vm5, %v1498_v58, 0  ;;  %v2545_v47 = vld [vmem:[%s2927_s3 + $0x38] sm:$0xff]   ;;  %v2552_v58 = vld [vmem:[%s2927_s3] sm:$0xff]  }
 0x544   : > { %2361 = vmatpush3.bf16.msra.mxu0 %v1283_v51  ;;  %2362 = vmatprep.mubr.msk.bf16.mxu0 %vm2676_vm2, %v2675_v38 }
 0x545   : > { %2372 = vmatprep.subr.bf16.mxu0 %v2675_v38 }
 0x548   : > { %v2566_v53 = vpop.eup %2565 }
 0x549   : > { %v1385_v55 = vmul.f32 %v2566_v53, %v2558_v31  ;;  %v2547_v53 = vld [vmem:[%s2927_s3 + $0x28] sm:$0xff]  }
 0x54b   : > { %2363 = vmatmul.mubr.msk.bf16.vlgmr.msra.gmra.mxu0 %vm1106_vm4, %v1276_v52  ;;  %v1386_v59 = vpack.c.bf16 %v1385_v55, %v1385_v55  ;;  %v2546_v52 = vld [vmem:[%s2927_s3 + $0x30] sm:$0xff]   ;;  %v2549_v55 = vld [vmem:[%s2927_s3 + $0x18] sm:$0xff]  }
 0x54c   : > { %2374 = vmatprep.mubr.msk.bf16.mxu0 %vm2676_vm2, %v2675_v38 }
 0x567   : > { %v1493_v54 = vpop.xlane.xlu1 %1492 }
 0x568   : > { %2567 = vrcp.f32 %v1493_v54  ;;  %v2548_v54 = vld [vmem:[%s2927_s3 + $0x20] sm:$0xff]  }
 0x56b   : > { %v1388_v56 = vpop.permute.xlu1 %1387 }
 0x56c   : > { %v1393_v57 = vsel %vm1170_vm5, %v1388_v56, 0  ;;  %v2550_v56 = vld [vmem:[%s2927_s3 + $0x10] sm:$0xff]  }
 0x56d   : > { %2373 = vmatpush3.bf16.msra.mxu0 %v1393_v57  ;;  %v2551_v57 = vld [vmem:[%s2927_s3 + $0x8] sm:$0xff]  }
 0x56e   : > { %2384 = vmatprep.subr.bf16.mxu0 %v2675_v38 }
 0x570   : > { %2375 = vmatmul.mubr.msk.bf16.vlgmr.msra.gmra.mxu0 %vm1106_vm4, %v1386_v59  ;;  %v2227_v59 = vld [vmem:[%s3286_s26] ss:$0 sm:$0xff] }
 0x571   : > { %2385 = vmatpush3.bf16.msra.mxu0 %v1503_v60  ;;  %2386 = vmatprep.mubr.msk.bf16.mxu0 %vm2676_vm2, %v2675_v38 }
 0x572   : > { %2398 = vmatprep.subr.bf16.mxu0 %v2675_v38 }
 0x575   : > { %v2568_v61 = vpop.eup %2567 }
 0x576   : > { %v1495_v62 = vmul.f32 %v2568_v61, %v2560_v36 }
 0x578   : > { %v1496_v63 = vpack.c.bf16 %v1495_v62, %v1495_v62 }
 0x57a   : > { %2387 = vmatmul.mubr.msk.bf16.vlgmr.msra.gmra.mxu0 %vm1106_vm4, %v1496_v63 }
 0x57b   : > { %2402 = vmatprep.mubr.msk.bf16.mxu0 %vm2676_vm2, %v2675_v38  ;;  %2399 = vmatpush3.bf16.msra.mxu0 %v2543_v39 }
 0x57c   : > { %2400 = vmatprep.subr.bf16.mxu0 %v2675_v38 }
 0x57f   : > { %2401 = vmatpush3.bf16.msra.mxu0 %v2544_v41 }
 0x603   : > { %v1208_v0 = vpop.f32.mrf.mxu0 }
 0x605   : > { %v2352_v1 = vpop.f32.mrf.mxu0 }
 0x607   : > { %v1211_v2 = vpop.f32.mrf.mxu0 }
 0x609   : > { %v2353_v3 = vpop.f32.mrf.mxu0 }
 0x60b   : > { %v1319_v4 = vpop.f32.mrf.mxu0 }
 0x60c   : > { %1546 = vrot.lane.b32.xlu1 %v1319_v4, %s2688_s28 }
 0x60d   : > { %v2364_v5 = vpop.f32.mrf.mxu0 }
 0x60f   : > { %v1322_v6 = vpop.f32.mrf.mxu0 }
 0x611   : > { %v2365_v7 = vpop.f32.mrf.mxu0 }
 0x630   : > { %v1429_v10 = vpop.f32.mrf.mxu0 }
 0x631   : > { %1550 = vrot.lane.b32.xlu0 %v1429_v10, %s2689_s22 }
 0x632   : > { %v2376_v11 = vpop.f32.mrf.mxu0 }
 0x634   : > { %v1432_v12 = vpop.f32.mrf.mxu0 }
 0x636   : > { %v2377_v13 = vpop.f32.mrf.mxu0 }
 0x63a   : > { %v1539_v14 = vpop.f32.mrf.mxu0 }
 0x63b   : > { %1554 = vrot.lane.b32.xlu1 %v1539_v14, %s2690_s2 }
 0x63c   : > { %v2388_v15 = vpop.f32.mrf.mxu0 }
 0x63e   : > { %v1542_v16 = vpop.f32.mrf.mxu0 }
 0x640   : > { %v2389_v17 = vpop.f32.mrf.mxu0 }
 0x67e   : > { %v1547_v18 = vpop.permute.xlu1 %1546 }
 0x67f   : > { %v1557_v20 = vsel %vm1106_vm4, %v1208_v0, %v1547_v18 }
 0x6a3   : > { %v1551_v19 = vpop.permute.xlu0 %1550 }
 0x6a4   : > { %v1559_v21 = vsel %vm1558_vm6, %v1557_v20, %v1551_v19 }
 0x6ad   : > { %v1555_v22 = vpop.permute.xlu1 %1554 }
 0x6ae   : > { %v1561_v23 = vsel %vm1560_vm7, %v1559_v21, %v1555_v22 }
 0x6af   : > { %v1562_v24 = vpack.c.bf16 %v1561_v23, %v1561_v23 }
 0x6b1   : > { %2395 = vmatmul.mubr.msk.bf16.vlgmr.msra.gmra.mxu1 %vm1056_vm3, %v1562_v24 }
 0x6b2   : > { %2422 = vmatprep.mubr.msk.bf16.mxu1 %vm2676_vm2, %v2675_v38  ;;  %2407 = vmatpush3.bf16.msra.mxu1 %v2545_v47 }
 0x6b3   : > { %2408 = vmatprep.subr.bf16.mxu1 %v2675_v38 }
 0x6b6   : > { %2409 = vmatpush3.bf16.msra.mxu1 %v2546_v52 }
 0x6b7   : > { %2410 = vmatprep.subr.bf16.mxu1 %v2675_v38 }
 0x6ba   : > { %2411 = vmatpush3.bf16.msra.mxu1 %v2547_v53 }
 0x6bb   : > { %2412 = vmatprep.subr.bf16.mxu1 %v2675_v38 }
 0x6be   : > { %2413 = vmatpush3.bf16.msra.mxu1 %v2548_v54 }
 0x6bf   : > { %2414 = vmatprep.subr.bf16.mxu1 %v2675_v38 }
 0x6c2   : > { %2415 = vmatpush3.bf16.msra.mxu1 %v2549_v55 }
 0x6c3   : > { %2416 = vmatprep.subr.bf16.mxu1 %v2675_v38 }
 0x6c6   : > { %2417 = vmatpush3.bf16.msra.mxu1 %v2550_v56 }
 0x6c7   : > { %2418 = vmatprep.subr.bf16.mxu1 %v2675_v38 }
 0x6ca   : > { %2419 = vmatpush3.bf16.msra.mxu1 %v2551_v57 }
 0x6cb   : > { %2420 = vmatprep.subr.bf16.mxu1 %v2675_v38 }
 0x6ce   : > { %2421 = vmatpush3.bf16.msra.mxu1 %v2552_v58 }
 0x771   : > { %v1623_v26 = vpop.f32.mrf.mxu1 }
 0x772   : > { %v1624_v27 = vadd.f32 %v2221_v25, %v1623_v26  ;;  %v2233_v26 = vld [vmem:[%s3288_s20] ss:$0 sm:$0xff] }
 0x773   : > { %v2396_v28 = vpop.f32.mrf.mxu1 }
 0x774   : > { %v1629_v29 = vadd.f32 %v1624_v27, %v2992_v40 }
 0x775   : > { %v1626_v30 = vpop.f32.mrf.mxu1 }
 0x776   : > { %v1632_v31 = vsel %vm1056_vm3, %v1629_v29, 0.0 }
 0x777   : > { %1633 = vadd.xlane.f32.xlu0 %v1632_v31  ;;  %v2397_v32 = vpop.f32.mrf.mxu1 }
 0x800   : > { %v1634_v33 = vpop.xlane.xlu0 %1633 }
 0x801   : > { %v1636_v34 = vmul.f32 0.03125, %v1634_v33 }
 0x803   : > { %v1637_v35 = vsub.f32 %v1629_v29, %v1636_v34 }
 0x805   : > { %v1638_v36 = vmul.f32 %v1637_v35, %v1637_v35 }
 0x807   : > { %v1639_v37 = vsel %vm1056_vm3, %v1638_v36, 0.0 }
 0x808   : > { %1640 = vadd.xlane.f32.xlu1 %v1639_v37 }
 0x891   : > { %v1641_v40 = vpop.xlane.xlu1 %1640 }
 0x892   : > { %v1642_v42 = vmul.f32 0.03125, %v1641_v40 }
 0x894   : > { %v1643_v43 = vadd.f32 1e-05, %v1642_v42 }
 0x896   : > { %2569 = vrsqrt.f32 %v1643_v43 }
 0x8a3   : > { %v2570_v44 = vpop.eup %2569 }
 0x8a4   : > { %v1645_v46 = vmul.f32 %v2570_v44, %v1637_v35  ;;  %v2242_v44 = vld [vmem:[%s839_s6] ss:$0 sm:$0xff] }
 0x8a6   : > { %v1652_v49 = vmul.f32 %v2225_v45, %v1645_v46  ;;  %v2243_v46 = vld [vmem:[%s842_s17] ss:$0 sm:$0xff] }
 0x8a8   : > { %v3095_v50 = vadd.f32 %v2226_v48, %v1652_v49 }
 0x8aa   : > { %v1660_v51 = vpack.c.bf16 %v3095_v50, %v3095_v50 }
 0x8ac   : > { %2403 = vmatmul.mubr.msk.bf16.vlgmr.msra.gmra.mxu0 %vm1056_vm3, %v1660_v51 }
 0x96c   : > { %v1721_v60 = vpop.f32.mrf.mxu0 }
 0x96d   : > { %v1722_v61 = vadd.f32 %v2227_v59, %v1721_v60 }
 0x96e   : > { %v2404_v62 = vpop.f32.mrf.mxu0 }
 0x96f   : > { %v1728_v63 = vmul.f32 0.70710677, %v1722_v61  ;;  %v1727_v22 = vmul.f32 0.5, %v1722_v61 }
 0x970   : > { %v1724_v0 = vpop.f32.mrf.mxu0 }
 0x971   : > { %v1729_v1 = vand.u32 2147483647, %v1728_v63  ;;  %vm1748_vm8 = vcmp.ge.f32.partialorder %v1728_v63, 0.0 }
 0x972   : > { %v2405_v2 = vpop.f32.mrf.mxu0 }
 0x973   : > { %v1730_v3 = vmul.f32 0.3275911, %v1729_v1  ;;  %v1742_v5 = vsub.f32 0.0, %v1729_v1 }
 0x975   : > { %v1731_v4 = vadd.f32 1.0, %v1730_v3  ;;  %v1743_v6 = vmul.f32 %v1742_v5, %v1729_v1 }
 0x977   : > { %2571 = vrcp.f32 %v1731_v4  ;;  %v1744_v8 = vmul.f32 1.442695, %v1743_v6 }
 0x979   : > { %2573 = vpow2.f32 %v1744_v8 }
 0x984   : > { %v2572_v38 = vpop.eup %2571 }
 0x985   : > { %v1733_v7 = vmul.f32 1.0614054, %v2572_v38 }
 0x986   : > { %v2574_v17 = vpop.eup %2573 }
 0x987   : > { %v2231_v9 = vadd.f32 -1.4531521, %v1733_v7 }
 0x989   : > { %v1735_v10 = vmul.f32 %v2572_v38, %v2231_v9 }
 0x98b   : > { %v1736_v11 = vadd.f32 1.4214138, %v1735_v10 }
 0x98d   : > { %v1737_v12 = vmul.f32 %v2572_v38, %v1736_v11 }
 0x98f   : > { %v2232_v13 = vadd.f32 -0.28449672, %v1737_v12 }
 0x991   : > { %v1739_v14 = vmul.f32 %v2572_v38, %v2232_v13 }
 0x993   : > { %v1740_v15 = vadd.f32 0.2548296, %v1739_v14 }
 0x995   : > { %v1741_v16 = vmul.f32 %v2572_v38, %v1740_v15 }
 0x997   : > { %v1746_v18 = vmul.f32 %v2574_v17, %v1741_v16 }
 0x999   : > { %v1747_v19 = vsub.f32 1.0, %v1746_v18 }
 0x99b   : > { %v1749_v20 = vsub.f32 0.0, %v1747_v19 }
 0x99d   : > { %v1750_v21 = vsel %vm1748_vm8, %v1747_v19, %v1749_v20 }
 0x99e   : > { %v1751_v23 = vadd.f32 1.0, %v1750_v21 }
 0x9a0   : > { %v1752_v24 = vmul.f32 %v1751_v23, %v1727_v22 }
 0x9a2   : > { %v1753_v25 = vpack.c.bf16 %v1752_v24, %v1752_v24 }
 0x9a4   : > { %2423 = vmatmul.mubr.bf16.vlgmr.msra.gmra.mxu1 %v1753_v25 }
 0xa64   : > { %v1859_v27 = vpop.f32.mrf.mxu1 }
 0xa65   : > { %v1860_v28 = vadd.f32 %v2233_v26, %v1859_v27 }
 0xa66   : > { %v2424_v29 = vpop.f32.mrf.mxu1 }
 0xa67   : > { %v1865_v30 = vadd.f32 %v1860_v28, %v3095_v50 }
 0xa68   : > { %v1862_v31 = vpop.f32.mrf.mxu1 }
 0xa69   : > { %v1868_v32 = vsel %vm1056_vm3, %v1865_v30, 0.0 }
 0xa6a   : > { %1869 = vadd.xlane.f32.xlu0 %v1868_v32  ;;  %v2425_v33 = vpop.f32.mrf.mxu1 }
 0xaf3   : > { %v1870_v34 = vpop.xlane.xlu0 %1869 }
 0xaf4   : > { %v1871_v35 = vmul.f32 0.03125, %v1870_v34 }
 0xaf6   : > { %v1872_v36 = vsub.f32 %v1865_v30, %v1871_v35 }
 0xaf8   : > { %v1873_v37 = vmul.f32 %v1872_v36, %v1872_v36 }
 0xafa   : > { %v1874_v39 = vsel %vm1056_vm3, %v1873_v37, 0.0 }
 0xafb   : > { %1875 = vadd.xlane.f32.xlu0 %v1874_v39 }
 0xb84   : > { %v1876_v41 = vpop.xlane.xlu0 %1875 }
 0xb85   : > { %v1877_v40 = vmul.f32 0.03125, %v1876_v41 }
 0xb87   : > { %v1878_v42 = vadd.f32 1e-05, %v1877_v40 }
 0xb89   : > { %2575 = vrsqrt.f32 %v1878_v42 }
 0xb96   : > { %v2576_v43 = vpop.eup %2575 }
 0xb97   : > { %v1880_v45 = vmul.f32 %v2576_v43, %v1872_v36 }
 0xb99   : > { %v1887_v48 = vmul.f32 %v2242_v44, %v1880_v45  ;;  %1899 = sbr.rel (%p2244_p1) target bundleno = 3182 (0xc6e), region = 108 }
 0xb9b   : > { %v1894_v49 = vadd.f32 %v2243_v46, %v1887_v48 }
 0xb9d   : > { %1895 = vst.msk [vmem:[#allocation2] sm:$0xff] %vm1056_vm3, %v1894_v49 }
 0xb9e   : > { %v2577_v50 = vld [vmem:[%s3291_s1 + $0x8] sm:$0xff]   ;;  %v2691_v51 = vmov 0.0   ;;  %v2578_v47 = vld [vmem:[%s3292_s30] sm:$0xff]   ;;  %vm2692_vm9 = vmmov 0   ;;  %v1900_v52 = vpack.c.bf16 %v1894_v49, %v1894_v49 }
 0xb9f   : > { %2426 = vmatprep.subr.bf16.mxu0 %v2691_v51  ;;  %2430 = vmatprep.mubr.msk.bf16.mxu0 %vm2692_vm9, %v2691_v51  ;;  %v2245_v53 = vld [vmem:[%s3293_s27] ss:$0 sm:$0xff] }
 0xba0   : > { %2427 = vmatpush3.bf16.msra.mxu0 %v2577_v50 }
 0xba1   : > { %2428 = vmatprep.subr.bf16.mxu0 %v2691_v51 }
 0xba4   : > { %2429 = vmatpush3.bf16.msra.mxu0 %v2578_v47 }
 0xba7   : > { %2431 = vmatmul.mubr.msk.bf16.vlgmr.msra.gmra.mxu0 %vm1056_vm3, %v1900_v52 }
 0xc67   : > { %v1961_v54 = vpop.f32.mrf.mxu0 }
 0xc68   : > { %v1962_v55 = vadd.f32 %v2245_v53, %v1961_v54 }
 0xc69   : > { %v2432_v56 = vpop.f32.mrf.mxu0 }
 0xc6a   : > { %1967 = vst [vmem:[%s791_s13] sm:$0xff] %v1962_v55 }
 0xc6b   : > { %v1964_v57 = vpop.f32.mrf.mxu0 }
 0xc6d   : > { %v2433_v58 = vpop.f32.mrf.mxu0 }
 0xc6e PF: > { %s3294_s26 = sld [smem:[#allocation10_spill]]  ;;  %s1982_s24 = sshll.u32 %s791_s13, 4  ;;  %s1983_s24 = int_to_ptr.vmem [resolvable:$true] %s1982_s24 }
 0xc6f   : > { %s3295_s3 = sld [smem:[#allocation7_spill]]  ;;  %s2579_s29 = scalar_lea.vmem %s1983_s24, 128 }
 0xc70   : > { %s3297_s22 = sld [smem:[#allocation33_spill]]  ;;  %p2580_p2 = scmp.ne.s32.totalorder %s1983_s24, %s2579_s29 }
 0xc71   : > { %s2693_s1 = smov [#allocation3]  }
 0xc72   : > { %p2581_p4 = pnand %p2580_p2, %p2848_p3  ;;  %s2583_s6 = sshll.u32 %s2693_s1, 4  ;;  %s2584_s6 = int_to_ptr.vmem [resolvable:$false] %s2583_s6 }
 0xc73   : > { %s2585_s23 = scalar_lea.vmem %s2584_s6, 256  ;;  %p2586_p6 = scmp.lt.s32.totalorder %s1983_s24, %s2584_s6 }
 0xc74   : > { %s2250_s19 = sshll.u32 %s3294_s26, 7  ;;  %p2582_p5 = pneg %p2581_p4 }
 0xc75   : > { %s3299_s8 = sand.u32 1, %s3295_s3   ;;  %p2587_p7 = scmp.lt.s32.totalorder %s2585_s23, %s2579_s29 }
 0xc76   : > { %s3298_s4 = smov %s3297_s22  ;;  %s1980_s2 = scalar_lea.hbm %s3297_s22, %s2250_s19 }
 0xc77   : > { %s1969_s5 = scalar_lea.sflag [#allocation4], %s3299_s8  ;;  %p2588_p8 = por %p2587_p7, %p2586_p6 }
 0xc79   : > { %p2589_p10 = pnand %p2588_p8, %p2582_p5 }
 0xc7b   : > { %2592 = shalt.err (!%p2589_p10)
}
 0xc7c   : > { %s2593_s21 = scalar_lea.hbm %s1980_s2, 128  ;;  %s2597_s17 = scalar_lea.hbm %s3298_s4, 256 }
 0xc7d   : > { %p2594_p11 = scmp.ne.s32.totalorder %s1980_s2, %s2593_s21  ;;  %p2598_p0 = scmp.lt.s32.totalorder %s1980_s2, %s3298_s4 }
 0xc7e   : > { %p2599_p1 = scmp.lt.s32.totalorder %s2597_s17, %s2593_s21 }
 0xc7f   : > { %p2595_p12 = pnand %p2594_p11, %p2848_p3 }
 0xc80   : > { %p2600_p2 = por %p2599_p1, %p2598_p0 }
 0xc81   : > { %p2596_p13 = pneg %p2595_p12 }
 0xc83   : > { %p2601_p4 = pnand %p2600_p2, %p2596_p13 }
 0xc85   : > { %2604 = shalt.err (!%p2601_p4)
}
 0xc86   : > { %2434 = dma.vmem_to_hbm [thread:$0]  (%p2848_p3), %s1983_s24, 128, %s1980_s2, %s1969_s5  }
 0xc87 PF: > { %s3300_s3 = sld [smem:[#allocation13_spill]] }
 0xc88   : > { %s3301_s19 = sld [smem:[#allocation6_spill]] }
 0xc8d   : > { %p2440_p5 = scmp.ge.s32.totalorder %s3300_s3, 2 }
 0xc8e   : > { %s1994_s28 = sand.u32 1, %s3301_s19  }
 0xc8f   : > { %p2437_p6 = pnand %p2440_p5, %p2858_p9  ;;  %s1995_s22 = scalar_lea.sflag [#allocation4], %s1994_s28 }
 0xc91   : > { %p2438_p7 = pneg %p2437_p6 }
 0xc93   : > { %2638 = dma.done.wait (%p2438_p7), %s1995_s22, 128  }
 0xc94   : > { %2640 = vsyncadd (%p2438_p7), %s1995_s22, 4294967168  ;;  %s33_s26 = sadd.s32 1, %s3300_s3   ;;  %s3303_s1 = sld [smem:[#allocation7_spill]] }
 0xc95   : > { %p30_p8 = scmp.ge.s32.totalorder %s33_s26, 6   ;;  %s3304_s22 = sld [smem:[#allocation8_spill]] }
 0xc96   : > { %s3305_s23 = sld [smem:[#allocation18_spill]] }
 0xc97   : > { %s3306_s24 = sld [smem:[#allocation11_spill]]  ;;  %32 = sbr.rel (!%p30_p8) target bundleno = 20 (0x14), region = 182 }
 0xc98   : > { %s3307_s2 = sld [smem:[#allocation12_spill]] }
 0xc99   : > { %s3308_s25 = sld [smem:[#allocation14_spill]] }
 0xc9a   : > { %s3309_s3 = sld [smem:[#allocation16_spill]] }
 0xc9c   :  { %2000 = vsyncpa [#allocation4], 1 }
 0xc9d   :  { %2002 = vsyncpa [#allocation4 + $0x1], 1 }

</bundles_post_ra>
